<compile_context>
chip_gen: v7x
topology: tpu7x:2x2x1
jax: 0.10.0
libtpu: 0.0.40
codegen_flags: <defaults>
</compile_context>

<pallas_src>
import functools

import jax
import jax.numpy as jnp
from jax import lax
from jax.experimental import pallas as pl
from jax.experimental.pallas import tpu as pltpu


def _round_up(x, m):
    return (x + m - 1) // m * m


def _pick_tile_rows(Hout, Wp, Wout, Cin_p, Cout_p, KH, dil, stride,
                    in_itemsize, out_itemsize, target_bytes=12 << 20):
    """Largest row-tile whose per-step working set fits a conservative VMEM target."""
    th = min(Hout, 64)
    while th > 8:
        th_in = (th - 1) * stride + dil * (KH - 1) + 1
        work = (2 * th_in * Wp * Cin_p * in_itemsize      # double-buffered input tile
                + 2 * th * Wout * Cout_p * out_itemsize   # double-buffered output tile
                + th * Wout * Cout_p * 4                  # local f32 accumulator
                + 2 * th * Wout * Cin_p * in_itemsize)    # patch temporaries
        if work <= target_bytes:
            return th
        th //= 2
    return max(min(th, Hout), 1)


def _conv_tile_kernel(x_ref, w_ref, b_ref, o_ref, *, KH, KW, TH, Wout, stride, dil):
    # x_ref : (TH_in, Wp, Cin_p)     halo row-tile (VMEM)
    # w_ref : (KH*KW, Cin_p, Cout_p) weights
    # b_ref : (1, Cout_p)            f32 bias
    # o_ref : (TH, Wout, Cout_p)     output tile
    cin_p = x_ref.shape[-1]
    cout_p = o_ref.shape[-1]

    # Accumulator lives in a local value, initialized with the bias so there is
    # no separate bias-add pass; o_ref is stored exactly once.
    acc = jnp.broadcast_to(b_ref[...].astype(jnp.float32), (TH * Wout, cout_p))

    for kh in range(KH):
        for kw in range(KW):
            r0 = kh * dil
            c0 = kw * dil
            if stride == 1:
                patch = x_ref[pl.ds(r0, TH), pl.ds(c0, Wout), :]
            else:
                # In-kernel striding: only the rows/cols that survive are loaded.
                patch = x_ref[pl.ds(r0, TH, stride), pl.ds(c0, Wout, stride), :]
            patch2d = patch.reshape(TH * Wout, cin_p)
            acc = acc + jnp.dot(patch2d, w_ref[kh * KW + kw],
                                preferred_element_type=jnp.float32)

    o_ref[...] = acc.reshape(TH, Wout, cout_p).astype(o_ref.dtype)


def conv_layer_forward(x_nchw, weight, bias, *, kernel_size, stride, dilation=1,
                       tile_rows=None, compute_dtype=None):
    """ConvLayer.forward.  x_nchw: (N, Cin, H, W); weight: (Cout, Cin, KH, KW)."""
    N, Cin, H, W = x_nchw.shape
    Cout, Cin_w, KH, KW = weight.shape
    assert Cin_w == Cin and KH == kernel_size and KW == kernel_size
    out_dtype = x_nchw.dtype

    # ---- glue: layout + padding (reflect / zero) -------------------------------
    x = jnp.transpose(x_nchw, (0, 2, 3, 1))                       # NHWC
    if dilation == 1:
        pad = kernel_size // 2
        xp = jnp.pad(x, ((0, 0), (pad, pad), (pad, pad), (0, 0)), mode="reflect")
    else:
        pad = dilation
        xp = jnp.pad(x, ((0, 0), (pad, pad), (pad, pad), (0, 0)))
    Hp, Wp = xp.shape[1], xp.shape[2]

    # PyTorch Conv2d output extents applied to the padded input (valid for any k).
    Hout = (Hp - dilation * (KH - 1) - 1) // stride + 1
    Wout = (Wp - dilation * (KW - 1) - 1) // stride + 1

    # Pad output width to a multiple of 8: keeps the in-kernel (TH, Wout) merge
    # layout-preserving.  Extra zero input columns feed only discarded outputs.
    Wout_p = _round_up(Wout, 8)
    need_cols = (Wout_p - 1) * stride + dilation * (KW - 1) + 1
    if need_cols > Wp:
        xp = jnp.pad(xp, ((0, 0), (0, 0), (0, need_cols - Wp), (0, 0)))
        Wp = need_cols

    # ---- lane-dense channel padding (multiples of 128) -------------------------
    Cin_p = _round_up(Cin, 128)
    Cout_p = _round_up(Cout, 128)

    if compute_dtype is not None:        # e.g. jnp.bfloat16 for 2x MXU / half DMA
        xp = xp.astype(compute_dtype)
    xp = jnp.pad(xp, ((0, 0), (0, 0), (0, 0), (0, Cin_p - Cin)))

    w = jnp.transpose(weight, (2, 3, 1, 0))                       # (KH, KW, Cin, Cout)
    if compute_dtype is not None:
        w = w.astype(compute_dtype)
    w = jnp.pad(w, ((0, 0), (0, 0), (0, Cin_p - Cin), (0, Cout_p - Cout)))
    w = w.reshape(KH * KW, Cin_p, Cout_p)
    b = jnp.pad(bias.astype(jnp.float32), (0, Cout_p - Cout)).reshape(1, Cout_p)

    in_itemsize = jnp.dtype(xp.dtype).itemsize
    out_itemsize = jnp.dtype(out_dtype).itemsize

    # ---- spatial row tiling with halos ------------------------------------------
    TH = tile_rows if tile_rows is not None else _pick_tile_rows(
        Hout, Wp, Wout_p, Cin_p, Cout_p, KH, dilation, stride, in_itemsize, out_itemsize)
    n_tiles = pl.cdiv(Hout, TH)
    Hout_pad = n_tiles * TH
    TH_in = (TH - 1) * stride + dilation * (KH - 1) + 1
    need_rows = (Hout_pad - 1) * stride + dilation * (KH - 1) + 1
    if need_rows > Hp:                    # extra rows feed discarded output rows only
        xp = jnp.pad(xp, ((0, 0), (0, need_rows - Hp), (0, 0), (0, 0)))

    # Gather the overlapping halo row-tiles once (glue; halo duplication is tiny),
    # so the BlockSpec index_map is plain non-overlapping block indexing.  When a
    # single tile covers the whole height this is just a reshape (no HBM copy).
    if n_tiles == 1:
        tiles = xp[:, None, :TH_in]                               # (N, 1, TH_in, Wp, Cin_p)
    else:
        tiles = jnp.stack(
            [xp[:, t * TH * stride: t * TH * stride + TH_in] for t in range(n_tiles)],
            axis=1)                                               # (N, n_tiles, TH_in, Wp, Cin_p)

    # ---- explicit VMEM budget for the chosen tile (v7x-safe) --------------------
    vmem_limit = (2 * TH_in * Wp * Cin_p * in_itemsize
                  + 2 * TH * Wout_p * Cout_p * out_itemsize
                  + 2 * KH * KW * Cin_p * Cout_p * jnp.dtype(w.dtype).itemsize
                  + TH * Wout_p * Cout_p * 4
                  + 2 * TH * Wout_p * Cin_p * 4
                  + (4 << 20))
    vmem_limit = int(max(min(vmem_limit, 64 << 20), 16 << 20))

    kernel = functools.partial(_conv_tile_kernel, KH=KH, KW=KW, TH=TH,
                               Wout=Wout_p, stride=stride, dil=dilation)

    out = pl.pallas_call(
        kernel,
        out_shape=jax.ShapeDtypeStruct((N, Hout_pad, Wout_p, Cout_p), out_dtype),
        grid_spec=pltpu.PrefetchScalarGridSpec(
            num_scalar_prefetch=0,
            grid=(N, n_tiles),
            in_specs=[
                pl.BlockSpec((None, None, TH_in, Wp, Cin_p),
                             lambda n, t: (n, t, 0, 0, 0)),
                pl.BlockSpec((KH * KW, Cin_p, Cout_p), lambda n, t: (0, 0, 0)),
                pl.BlockSpec((1, Cout_p), lambda n, t: (0, 0)),
            ],
            out_specs=pl.BlockSpec((None, TH, Wout_p, Cout_p),
                                   lambda n, t: (n, t, 0, 0)),
        ),
        compiler_params=pltpu.CompilerParams(
            dimension_semantics=("parallel", "parallel"),
            vmem_limit_bytes=vmem_limit,
        ),
    )(tiles, w, b)

    out = out[:, :Hout, :Wout, :Cout]             # strip row / col / channel padding
    return jnp.transpose(out, (0, 3, 1, 2))       # back to NCHW


def _reference_conv(x_nchw, weight, bias, *, kernel_size, stride, dilation=1):
    """Plain-JAX reference (lax conv) matching the PyTorch semantics."""
    if dilation == 1:
        pad = kernel_size // 2
        xp = jnp.pad(x_nchw, ((0, 0), (0, 0), (pad, pad), (pad, pad)), mode="reflect")
        pads = ((0, 0), (0, 0))
    else:
        xp = x_nchw
        pads = ((dilation, dilation), (dilation, dilation))
    out = lax.conv_general_dilated(
        xp, weight,
        window_strides=(stride, stride),
        padding=pads,
        rhs_dilation=(dilation, dilation),
        dimension_numbers=("NCHW", "OIHW", "NCHW"),
    )
    return out + bias.reshape(1, -1, 1, 1)


if __name__ == "__main__":
    key = jax.random.PRNGKey(0)
    k_x, k_w, k_b, k_w5, k_b5 = jax.random.split(key, 5)

    N, Cin, H, W = 2, 4, 16, 16
    Cout, K = 8, 3

    x = jax.random.normal(k_x, (N, Cin, H, W), dtype=jnp.float32)
    weight = jax.random.normal(k_w, (Cout, Cin, K, K), dtype=jnp.float32) * 0.1
    bias = jax.random.normal(k_b, (Cout,), dtype=jnp.float32) * 0.1

    # Branch 1: dilation == 1  (ReflectionPad2d + Conv2d)
    f1 = jax.jit(functools.partial(conv_layer_forward, kernel_size=K, stride=1, dilation=1))
    out1 = jax.block_until_ready(f1(x, weight, bias))
    ref1 = _reference_conv(x, weight, bias, kernel_size=K, stride=1, dilation=1)
    assert out1.shape == ref1.shape, (out1.shape, ref1.shape)
    assert jnp.allclose(out1, ref1, atol=1e-4, rtol=1e-4), float(
        jnp.max(jnp.abs(out1 - ref1)))

    # Branch 2: dilation > 1  (zero-padded dilated Conv2d)
    f2 = jax.jit(functools.partial(conv_layer_forward, kernel_size=K, stride=1, dilation=2))
    out2 = jax.block_until_ready(f2(x, weight, bias))
    ref2 = _reference_conv(x, weight, bias, kernel_size=K, stride=1, dilation=2)
    assert out2.shape == ref2.shape, (out2.shape, ref2.shape)
    assert jnp.allclose(out2, ref2, atol=1e-4, rtol=1e-4), float(
        jnp.max(jnp.abs(out2 - ref2)))

    # Branch 1 again with kernel_size = 5 (wider reflect pad, 25 taps)
    K5 = 5
    weight5 = jax.random.normal(k_w5, (Cout, Cin, K5, K5), dtype=jnp.float32) * 0.1
    bias5 = jax.random.normal(k_b5, (Cout,), dtype=jnp.float32) * 0.1
    f3 = jax.jit(functools.partial(conv_layer_forward, kernel_size=K5, stride=1, dilation=1))
    out3 = jax.block_until_ready(f3(x, weight5, bias5))
    ref3 = _reference_conv(x, weight5, bias5, kernel_size=K5, stride=1, dilation=1)
    assert out3.shape == ref3.shape, (out3.shape, ref3.shape)
    assert jnp.allclose(out3, ref3, atol=1e-4, rtol=1e-4), float(
        jnp.max(jnp.abs(out3 - ref3)))

    print("KERNEL_OK")
</pallas_src>

<mosaic_0001>
module attributes {stable_mosaic.version = 11 : i64} {
  func.func @_conv_tile_kernel(%arg0: i32, %arg1: i32, %arg2: memref<1x1x18x18x128xf32, #tpu.memory_space<vmem>>, %arg3: memref<9x128x128xf32, #tpu.memory_space<vmem>>, %arg4: memref<1x128xf32, #tpu.memory_space<vmem>>, %arg5: memref<1x16x16x128xf32, #tpu.memory_space<vmem>>) attributes {dimension_semantics = [#tpu.dimension_semantics<parallel>, #tpu.dimension_semantics<parallel>], iteration_bounds = array<i64: 2, 1>, scalar_prefetch = 0 : i64, scratch_operands = 0 : i64, tpu.core_type = #tpu.core_type<tc>, window_params = [{transform_indices = @transform_0, window_bounds = array<i64: 1, 1, 18, 18, 128>}, {pipeline_mode = #tpu.pipeline_mode<synchronous>, transform_indices = @transform_1, window_bounds = array<i64: 9, 128, 128>}, {pipeline_mode = #tpu.pipeline_mode<synchronous>, transform_indices = @transform_2, window_bounds = array<i64: 1, 128>}, {transform_indices = @transform_3, window_bounds = array<i64: 1, 16, 16, 128>}]} {
    %c0 = arith.constant 0 : index
    %c0_0 = arith.constant 0 : index
    %0 = vector.load %arg4[%c0, %c0_0] : memref<1x128xf32, #tpu.memory_space<vmem>>, vector<1x128xf32>
    %1 = vector.shape_cast %0 : vector<1x128xf32> to vector<1x128xf32>
    %2 = vector.broadcast %1 : vector<1x128xf32> to vector<256x128xf32>
    %c0_1 = arith.constant 0 : index
    %c0_2 = arith.constant 0 : index
    %c0_3 = arith.constant 0 : index
    %c0_4 = arith.constant 0 : index
    %c0_5 = arith.constant 0 : index
    %3 = vector.load %arg2[%c0_1, %c0_2, %c0_3, %c0_4, %c0_5] : memref<1x1x18x18x128xf32, #tpu.memory_space<vmem>>, vector<1x1x16x16x128xf32>
    %4 = vector.shape_cast %3 : vector<1x1x16x16x128xf32> to vector<16x16x128xf32>
    %5 = vector.shape_cast %4 : vector<16x16x128xf32> to vector<256x128xf32>
    %c0_6 = arith.constant 0 : index
    %c0_7 = arith.constant 0 : index
    %c0_8 = arith.constant 0 : index
    %6 = vector.load %arg3[%c0_6, %c0_7, %c0_8] : memref<9x128x128xf32, #tpu.memory_space<vmem>>, vector<1x128x128xf32>
    %7 = vector.shape_cast %6 : vector<1x128x128xf32> to vector<128x128xf32>
    %cst = arith.constant dense<0.000000e+00> : vector<256x128xf32>
    %8 = tpu.matmul %5, %7, %cst {dimension_numbers = #tpu.dot_dimension_numbers<[1], [0], [0], [1], [0, 0, 1, 1], [], []>} : vector<256x128xf32>, vector<128x128xf32>, vector<256x128xf32> -> vector<256x128xf32>
    %9 = arith.addf %2, %8 : vector<256x128xf32>
    %c0_9 = arith.constant 0 : index
    %c0_10 = arith.constant 0 : index
    %c0_11 = arith.constant 0 : index
    %c1 = arith.constant 1 : index
    %c0_12 = arith.constant 0 : index
    %10 = vector.load %arg2[%c0_9, %c0_10, %c0_11, %c1, %c0_12] : memref<1x1x18x18x128xf32, #tpu.memory_space<vmem>>, vector<1x1x16x16x128xf32>
    %11 = vector.shape_cast %10 : vector<1x1x16x16x128xf32> to vector<16x16x128xf32>
    %12 = vector.shape_cast %11 : vector<16x16x128xf32> to vector<256x128xf32>
    %c1_13 = arith.constant 1 : index
    %c0_14 = arith.constant 0 : index
    %c0_15 = arith.constant 0 : index
    %13 = vector.load %arg3[%c1_13, %c0_14, %c0_15] : memref<9x128x128xf32, #tpu.memory_space<vmem>>, vector<1x128x128xf32>
    %14 = vector.shape_cast %13 : vector<1x128x128xf32> to vector<128x128xf32>
    %cst_16 = arith.constant dense<0.000000e+00> : vector<256x128xf32>
    %15 = tpu.matmul %12, %14, %cst_16 {dimension_numbers = #tpu.dot_dimension_numbers<[1], [0], [0], [1], [0, 0, 1, 1], [], []>} : vector<256x128xf32>, vector<128x128xf32>, vector<256x128xf32> -> vector<256x128xf32>
    %16 = arith.addf %9, %15 : vector<256x128xf32>
    %c0_17 = arith.constant 0 : index
    %c0_18 = arith.constant 0 : index
    %c0_19 = arith.constant 0 : index
    %c2 = arith.constant 2 : index
    %c0_20 = arith.constant 0 : index
    %17 = vector.load %arg2[%c0_17, %c0_18, %c0_19, %c2, %c0_20] : memref<1x1x18x18x128xf32, #tpu.memory_space<vmem>>, vector<1x1x16x16x128xf32>
    %18 = vector.shape_cast %17 : vector<1x1x16x16x128xf32> to vector<16x16x128xf32>
    %19 = vector.shape_cast %18 : vector<16x16x128xf32> to vector<256x128xf32>
    %c2_21 = arith.constant 2 : index
    %c0_22 = arith.constant 0 : index
    %c0_23 = arith.constant 0 : index
    %20 = vector.load %arg3[%c2_21, %c0_22, %c0_23] : memref<9x128x128xf32, #tpu.memory_space<vmem>>, vector<1x128x128xf32>
    %21 = vector.shape_cast %20 : vector<1x128x128xf32> to vector<128x128xf32>
    %cst_24 = arith.constant dense<0.000000e+00> : vector<256x128xf32>
    %22 = tpu.matmul %19, %21, %cst_24 {dimension_numbers = #tpu.dot_dimension_numbers<[1], [0], [0], [1], [0, 0, 1, 1], [], []>} : vector<256x128xf32>, vector<128x128xf32>, vector<256x128xf32> -> vector<256x128xf32>
    %23 = arith.addf %16, %22 : vector<256x128xf32>
    %c0_25 = arith.constant 0 : index
    %c0_26 = arith.constant 0 : index
    %c1_27 = arith.constant 1 : index
    %c0_28 = arith.constant 0 : index
    %c0_29 = arith.constant 0 : index
    %24 = vector.load %arg2[%c0_25, %c0_26, %c1_27, %c0_28, %c0_29] : memref<1x1x18x18x128xf32, #tpu.memory_space<vmem>>, vector<1x1x16x16x128xf32>
    %25 = vector.shape_cast %24 : vector<1x1x16x16x128xf32> to vector<16x16x128xf32>
    %26 = vector.shape_cast %25 : vector<16x16x128xf32> to vector<256x128xf32>
    %c3 = arith.constant 3 : index
    %c0_30 = arith.constant 0 : index
    %c0_31 = arith.constant 0 : index
    %27 = vector.load %arg3[%c3, %c0_30, %c0_31] : memref<9x128x128xf32, #tpu.memory_space<vmem>>, vector<1x128x128xf32>
    %28 = vector.shape_cast %27 : vector<1x128x128xf32> to vector<128x128xf32>
    %cst_32 = arith.constant dense<0.000000e+00> : vector<256x128xf32>
    %29 = tpu.matmul %26, %28, %cst_32 {dimension_numbers = #tpu.dot_dimension_numbers<[1], [0], [0], [1], [0, 0, 1, 1], [], []>} : vector<256x128xf32>, vector<128x128xf32>, vector<256x128xf32> -> vector<256x128xf32>
    %30 = arith.addf %23, %29 : vector<256x128xf32>
    %c0_33 = arith.constant 0 : index
    %c0_34 = arith.constant 0 : index
    %c1_35 = arith.constant 1 : index
    %c1_36 = arith.constant 1 : index
    %c0_37 = arith.constant 0 : index
    %31 = vector.load %arg2[%c0_33, %c0_34, %c1_35, %c1_36, %c0_37] : memref<1x1x18x18x128xf32, #tpu.memory_space<vmem>>, vector<1x1x16x16x128xf32>
    %32 = vector.shape_cast %31 : vector<1x1x16x16x128xf32> to vector<16x16x128xf32>
    %33 = vector.shape_cast %32 : vector<16x16x128xf32> to vector<256x128xf32>
    %c4 = arith.constant 4 : index
    %c0_38 = arith.constant 0 : index
    %c0_39 = arith.constant 0 : index
    %34 = vector.load %arg3[%c4, %c0_38, %c0_39] : memref<9x128x128xf32, #tpu.memory_space<vmem>>, vector<1x128x128xf32>
    %35 = vector.shape_cast %34 : vector<1x128x128xf32> to vector<128x128xf32>
    %cst_40 = arith.constant dense<0.000000e+00> : vector<256x128xf32>
    %36 = tpu.matmul %33, %35, %cst_40 {dimension_numbers = #tpu.dot_dimension_numbers<[1], [0], [0], [1], [0, 0, 1, 1], [], []>} : vector<256x128xf32>, vector<128x128xf32>, vector<256x128xf32> -> vector<256x128xf32>
    %37 = arith.addf %30, %36 : vector<256x128xf32>
    %c0_41 = arith.constant 0 : index
    %c0_42 = arith.constant 0 : index
    %c1_43 = arith.constant 1 : index
    %c2_44 = arith.constant 2 : index
    %c0_45 = arith.constant 0 : index
    %38 = vector.load %arg2[%c0_41, %c0_42, %c1_43, %c2_44, %c0_45] : memref<1x1x18x18x128xf32, #tpu.memory_space<vmem>>, vector<1x1x16x16x128xf32>
    %39 = vector.shape_cast %38 : vector<1x1x16x16x128xf32> to vector<16x16x128xf32>
    %40 = vector.shape_cast %39 : vector<16x16x128xf32> to vector<256x128xf32>
    %c5 = arith.constant 5 : index
    %c0_46 = arith.constant 0 : index
    %c0_47 = arith.constant 0 : index
    %41 = vector.load %arg3[%c5, %c0_46, %c0_47] : memref<9x128x128xf32, #tpu.memory_space<vmem>>, vector<1x128x128xf32>
    %42 = vector.shape_cast %41 : vector<1x128x128xf32> to vector<128x128xf32>
    %cst_48 = arith.constant dense<0.000000e+00> : vector<256x128xf32>
    %43 = tpu.matmul %40, %42, %cst_48 {dimension_numbers = #tpu.dot_dimension_numbers<[1], [0], [0], [1], [0, 0, 1, 1], [], []>} : vector<256x128xf32>, vector<128x128xf32>, vector<256x128xf32> -> vector<256x128xf32>
    %44 = arith.addf %37, %43 : vector<256x128xf32>
    %c0_49 = arith.constant 0 : index
    %c0_50 = arith.constant 0 : index
    %c2_51 = arith.constant 2 : index
    %c0_52 = arith.constant 0 : index
    %c0_53 = arith.constant 0 : index
    %45 = vector.load %arg2[%c0_49, %c0_50, %c2_51, %c0_52, %c0_53] : memref<1x1x18x18x128xf32, #tpu.memory_space<vmem>>, vector<1x1x16x16x128xf32>
    %46 = vector.shape_cast %45 : vector<1x1x16x16x128xf32> to vector<16x16x128xf32>
    %47 = vector.shape_cast %46 : vector<16x16x128xf32> to vector<256x128xf32>
    %c6 = arith.constant 6 : index
    %c0_54 = arith.constant 0 : index
    %c0_55 = arith.constant 0 : index
    %48 = vector.load %arg3[%c6, %c0_54, %c0_55] : memref<9x128x128xf32, #tpu.memory_space<vmem>>, vector<1x128x128xf32>
    %49 = vector.shape_cast %48 : vector<1x128x128xf32> to vector<128x128xf32>
    %cst_56 = arith.constant dense<0.000000e+00> : vector<256x128xf32>
    %50 = tpu.matmul %47, %49, %cst_56 {dimension_numbers = #tpu.dot_dimension_numbers<[1], [0], [0], [1], [0, 0, 1, 1], [], []>} : vector<256x128xf32>, vector<128x128xf32>, vector<256x128xf32> -> vector<256x128xf32>
    %51 = arith.addf %44, %50 : vector<256x128xf32>
    %c0_57 = arith.constant 0 : index
    %c0_58 = arith.constant 0 : index
    %c2_59 = arith.constant 2 : index
    %c1_60 = arith.constant 1 : index
    %c0_61 = arith.constant 0 : index
    %52 = vector.load %arg2[%c0_57, %c0_58, %c2_59, %c1_60, %c0_61] : memref<1x1x18x18x128xf32, #tpu.memory_space<vmem>>, vector<1x1x16x16x128xf32>
    %53 = vector.shape_cast %52 : vector<1x1x16x16x128xf32> to vector<16x16x128xf32>
    %54 = vector.shape_cast %53 : vector<16x16x128xf32> to vector<256x128xf32>
    %c7 = arith.constant 7 : index
    %c0_62 = arith.constant 0 : index
    %c0_63 = arith.constant 0 : index
    %55 = vector.load %arg3[%c7, %c0_62, %c0_63] : memref<9x128x128xf32, #tpu.memory_space<vmem>>, vector<1x128x128xf32>
    %56 = vector.shape_cast %55 : vector<1x128x128xf32> to vector<128x128xf32>
    %cst_64 = arith.constant dense<0.000000e+00> : vector<256x128xf32>
    %57 = tpu.matmul %54, %56, %cst_64 {dimension_numbers = #tpu.dot_dimension_numbers<[1], [0], [0], [1], [0, 0, 1, 1], [], []>} : vector<256x128xf32>, vector<128x128xf32>, vector<256x128xf32> -> vector<256x128xf32>
    %58 = arith.addf %51, %57 : vector<256x128xf32>
    %c0_65 = arith.constant 0 : index
    %c0_66 = arith.constant 0 : index
    %c2_67 = arith.constant 2 : index
    %c2_68 = arith.constant 2 : index
    %c0_69 = arith.constant 0 : index
    %59 = vector.load %arg2[%c0_65, %c0_66, %c2_67, %c2_68, %c0_69] : memref<1x1x18x18x128xf32, #tpu.memory_space<vmem>>, vector<1x1x16x16x128xf32>
    %60 = vector.shape_cast %59 : vector<1x1x16x16x128xf32> to vector<16x16x128xf32>
    %61 = vector.shape_cast %60 : vector<16x16x128xf32> to vector<256x128xf32>
    %c8 = arith.constant 8 : index
    %c0_70 = arith.constant 0 : index
    %c0_71 = arith.constant 0 : index
    %62 = vector.load %arg3[%c8, %c0_70, %c0_71] : memref<9x128x128xf32, #tpu.memory_space<vmem>>, vector<1x128x128xf32>
    %63 = vector.shape_cast %62 : vector<1x128x128xf32> to vector<128x128xf32>
    %cst_72 = arith.constant dense<0.000000e+00> : vector<256x128xf32>
    %64 = tpu.matmul %61, %63, %cst_72 {dimension_numbers = #tpu.dot_dimension_numbers<[1], [0], [0], [1], [0, 0, 1, 1], [], []>} : vector<256x128xf32>, vector<128x128xf32>, vector<256x128xf32> -> vector<256x128xf32>
    %65 = arith.addf %58, %64 : vector<256x128xf32>
    %66 = vector.shape_cast %65 : vector<256x128xf32> to vector<16x16x128xf32>
    %c0_73 = arith.constant 0 : index
    %c0_74 = arith.constant 0 : index
    %c0_75 = arith.constant 0 : index
    %c0_76 = arith.constant 0 : index
    %67 = vector.load %arg5[%c0_73, %c0_74, %c0_75, %c0_76] : memref<1x16x16x128xf32, #tpu.memory_space<vmem>>, vector<1x16x16x128xf32>
    %68 = vector.shape_cast %67 : vector<1x16x16x128xf32> to vector<16x16x128xf32>
    %69 = vector.shape_cast %66 : vector<16x16x128xf32> to vector<1x16x16x128xf32>
    tpu.vector_store %arg5[%c0_73, %c0_74, %c0_75, %c0_76], %69 {strides = array<i32>} : memref<1x16x16x128xf32, #tpu.memory_space<vmem>>, vector<1x16x16x128xf32>,
    return
  }
  func.func @transform_0(%arg0: i32, %arg1: i32) -> (i32, i32, i32, i32, i32) {
    %c0_i32 = arith.constant 0 : i32
    %c0_i32_0 = arith.constant 0 : i32
    %c0_i32_1 = arith.constant 0 : i32
    %c0_i32_2 = arith.constant 0 : i32
    return %arg0, %arg1, %c0_i32, %c0_i32_0, %c0_i32_1 : i32, i32, i32, i32, i32
  }
  func.func @transform_1(%arg0: i32, %arg1: i32) -> (i32, i32, i32) {
    %c0_i32 = arith.constant 0 : i32
    %c0_i32_0 = arith.constant 0 : i32
    %c0_i32_1 = arith.constant 0 : i32
    %c0_i32_2 = arith.constant 0 : i32
    return %c0_i32, %c0_i32_0, %c0_i32_1 : i32, i32, i32
  }
  func.func @transform_2(%arg0: i32, %arg1: i32) -> (i32, i32) {
    %c0_i32 = arith.constant 0 : i32
    %c0_i32_0 = arith.constant 0 : i32
    %c0_i32_1 = arith.constant 0 : i32
    return %c0_i32, %c0_i32_0 : i32, i32
  }
  func.func @transform_3(%arg0: i32, %arg1: i32) -> (i32, i32, i32, i32) {
    %c0_i32 = arith.constant 0 : i32
    %c0_i32_0 = arith.constant 0 : i32
    %c0_i32_1 = arith.constant 0 : i32
    return %arg0, %arg1, %c0_i32, %c0_i32_0 : i32, i32, i32, i32
  }
}

</mosaic_0001>

<bundles_post_ra>
// kernel: conv_layer_forward.1
= control target key start
LH: loop header
LB: loop body
LE: loop exit
PB: predicated region body
PF: predicated region fallthrough
CT: control target
= control target key end

     0   :  { %s5245_s12 = smov 0   ;;  %s5247_s13 = smov 0   ;;  %s6415_s0 = inlined_call_operand.vmem [shape: f32[2,1,18,18,128], index: 0, kind: input, shape index: {}]   ;;  %s6416_s1 = inlined_call_operand.vmem [shape: f32[9,128,128], index: 1, kind: input, shape index: {}]   ;;  %s6417_s2 = inlined_call_operand.vmem [shape: f32[1,128], index: 2, kind: input, shape index: {}]   ;;  %s6418_s3 = inlined_call_operand.vmem [shape: f32[2,16,16,128], index: 3, kind: output, shape index: {}]  }
   0x1   :  { %s5249_s14 = smov 0  }
   0x2 LB: > { %s25_s15 = sadd.s32 1, %s5219_s13  ;;  %p3104_p0 = scmp.ge.s32.totalorder %s5223_s14, 1  ;;  %s5223_s14 = sphi %s5249_s14, %s13_s14   ;;  %s5219_s13 = sphi %s5247_s13, %s6479_s13   ;;  %s5215_s12 = sphi %s5245_s12, %s6478_s12  }
   0x3   : > { %p27_p1 = scmp.ge.s32.totalorder %s25_s15, 2  ;;  %p157_p2 = scmp.lt.s32.totalorder %s5223_s14, 3 }
   0x5   : > { %s6481_s15 = smov (%p27_p1, %s25_s15), 0  ;;  %p158_p3 = pnand %p3104_p0, %p157_p2 }
   0x7   : > { %161 = sbr.rel (%p158_p3) target bundleno = 551 (0x227), region = 32 }
   0xe   : > { %v249_v0 = vld [vmem:[%s6416_s1] sm:$0xff]  ;;  %v250_v1 = vld [vmem:[%s6416_s1 + $0x8] sm:$0xff]  ;;  %p190_p4 = scmp.lt.s32.totalorder %s5215_s12, 1  ;;  %v251_v5 = vld [vmem:[%s6416_s1 + $0x10] sm:$0xff] }
   0xf   : > { %v3221_v2 = vld [vmem:[%s6416_s1 + $0x200] sm:$0xff]  ;;  %v4584_v3 = vpack.c.bf16 %v250_v1, %v249_v0  ;;  %v3222_v4 = vld [vmem:[%s6416_s1 + $0x208] sm:$0xff]  ;;  %v252_v6 = vld [vmem:[%s6416_s1 + $0x18] sm:$0xff] }
  0x10   : > { %v5281_v7 = vpack.c.bf16 %v3222_v4, %v3221_v2  ;;  %v4588_v8 = vpack.c.bf16 %v252_v6, %v251_v5  ;;  %v3223_v9 = vld [vmem:[%s6416_s1 + $0x210] sm:$0xff]  ;;  %v3224_v10 = vld [vmem:[%s6416_s1 + $0x218] sm:$0xff]  ;;  %v253_v11 = vld [vmem:[%s6416_s1 + $0x20] sm:$0xff]  ;;  %s6483_s12 = smov (!%p190_p4, %s5215_s12), 1 }
  0x11   : > { %4585 = vmatprep.subr.bf16.mxu1 %v4584_v3  ;;  %v5294_v12 = vpack.c.bf16 %v3224_v10, %v3223_v9  ;;  %v254_v13 = vld [vmem:[%s6416_s1 + $0x28] sm:$0xff]  ;;  %v3225_v14 = vld [vmem:[%s6416_s1 + $0x220] sm:$0xff]  ;;  %s5176_s17 = smul.u32 432, %s6483_s12  ;;  %v255_v18 = vld [vmem:[%s6416_s1 + $0x30] sm:$0xff]  ;;  %s3431_s21 = sshll.u32 %s6483_s12, 8 }
  0x12   : > { %6444 = vst [vmem:[#allocation2_spill] sm:$0xff] %v5281_v7  ;;  %v3226_v15 = vld [vmem:[%s6416_s1 + $0x228] sm:$0xff]  ;;  %4713 = vmatprep.subr.bf16.mxu0 %v5281_v7  ;;  %4587 = vmatpush3.bf16.msra.mxu1 %v4584_v3  ;;  %v4592_v16 = vpack.c.bf16 %v254_v13, %v253_v11  ;;  %v256_v19 = vld [vmem:[%s6416_s1 + $0x38] sm:$0xff]  ;;  %v3227_v20 = vld [vmem:[%s6416_s1 + $0x230] sm:$0xff]  ;;  %s6342_s24 = scalar_lea.vmem %s6418_s3, %s3431_s21 }
  0x13   : > { %6445 = vst [vmem:[#allocation3_spill] sm:$0xff] %v5294_v12  ;;  %4715 = vmatpush3.bf16.msra.mxu0 %v5281_v7  ;;  %4589 = vmatprep.subr.bf16.mxu1 %v4588_v8  ;;  %v5309_v17 = vpack.c.bf16 %v3226_v15, %v3225_v14  ;;  %v3228_v21 = vld [vmem:[%s6416_s1 + $0x238] sm:$0xff]  ;;  %s5326_s28 = scalar_lea.vmem %s6415_s0, %s5176_s17  ;;  %v4596_v22 = vpack.c.bf16 %v256_v19, %v255_v18  ;;  %v257_v24 = vld [vmem:[%s6416_s1 + $0x40] sm:$0xff]  ;;  %v258_v25 = vld [vmem:[%s6416_s1 + $0x48] sm:$0xff] }
  0x14   : > { %4717 = vmatprep.subr.bf16.mxu0 %v5294_v12  ;;  %v5330_v23 = vpack.c.bf16 %v3228_v21, %v3227_v20  ;;  %v217_v26 = vld [vmem:[%s5326_s28] sm:$0xff]  ;;  %v3230_v28 = vld [vmem:[%s6416_s1 + $0x248] sm:$0xff]  ;;  %v4600_v30 = vpack.c.bf16 %v258_v25, %v257_v24  ;;  %v259_v32 = vld [vmem:[%s6416_s1 + $0x50] sm:$0xff] }
  0x15   : > { %6446 = vst [vmem:[#allocation4_spill] sm:$0xff] %v5309_v17  ;;  %v3229_v27 = vld [vmem:[%s6416_s1 + $0x240] sm:$0xff]  ;;  %3896 = vmatprep.mubr.f32.mxu1 %v217_v26  ;;  %v260_v33 = vld [vmem:[%s6416_s1 + $0x58] sm:$0xff]  ;;  %v3231_v34 = vld [vmem:[%s6416_s1 + $0x250] sm:$0xff] }
  0x16   : > { %4591 = vmatpush3.bf16.msra.mxu1 %v4588_v8  ;;  %6447 = vst [vmem:[#allocation5_spill] sm:$0xff] %v5330_v23  ;;  %v5346_v29 = vld [vmem:[%s5326_s28 + $0x19] sm:$0xff]  ;;  %v5351_v31 = vpack.c.bf16 %v3230_v28, %v3229_v27  ;;  %v4604_v36 = vpack.c.bf16 %v260_v33, %v259_v32  ;;  %v262_v39 = vld [vmem:[%s6416_s1 + $0x68] sm:$0xff]  ;;  %v263_v44 = vld [vmem:[%s6416_s1 + $0x70] sm:$0xff] }
  0x17   : > { %4719 = vmatpush3.bf16.msra.mxu0 %v5294_v12  ;;  %4593 = vmatprep.subr.bf16.mxu1 %v4592_v16  ;;  %v3232_v35 = vld [vmem:[%s6416_s1 + $0x258] sm:$0xff]  ;;  %v261_v38 = vld [vmem:[%s6416_s1 + $0x60] sm:$0xff]  ;;  %v3234_v41 = vld [vmem:[%s6416_s1 + $0x268] sm:$0xff] }
  0x18   : > { %4721 = vmatprep.subr.bf16.mxu0 %v5309_v17  ;;  %4216 = vmatprep.mubr.f32.mxu0 %v5346_v29  ;;  %6448 = vst [vmem:[#allocation6_spill] sm:$0xff] %v5351_v31  ;;  %v5367_v37 = vpack.c.bf16 %v3232_v35, %v3231_v34  ;;  %v3233_v40 = vld [vmem:[%s6416_s1 + $0x260] sm:$0xff]  ;;  %v4608_v42 = vpack.c.bf16 %v262_v39, %v261_v38  ;;  %v264_v45 = vld [vmem:[%s6416_s1 + $0x78] sm:$0xff]  ;;  %v3235_v46 = vld [vmem:[%s6416_s1 + $0x270] sm:$0xff] }
  0x19   : > { %v5383_v43 = vpack.c.bf16 %v3234_v41, %v3233_v40  ;;  %v3236_v47 = vld [vmem:[%s6416_s1 + $0x278] sm:$0xff]  ;;  %v4612_v48 = vpack.c.bf16 %v264_v45, %v263_v44  ;;  %v3109_v50 = vld [vmem:[%s6416_s1 + $0x80] sm:$0xff]  ;;  %v3110_v51 = vld [vmem:[%s6416_s1 + $0x88] sm:$0xff] }
  0x1a   : > { %4595 = vmatpush3.bf16.msra.mxu1 %v4592_v16  ;;  %6449 = vst [vmem:[#allocation7_spill] sm:$0xff] %v5367_v37  ;;  %v5399_v49 = vpack.c.bf16 %v3236_v47, %v3235_v46  ;;  %v3269_v52 = vld [vmem:[%s6416_s1 + $0x280] sm:$0xff]  ;;  %v3270_v53 = vld [vmem:[%s6416_s1 + $0x288] sm:$0xff]  ;;  %v4616_v54 = vpack.c.bf16 %v3110_v51, %v3109_v50  ;;  %v3271_v56 = vld [vmem:[%s6416_s1 + $0x290] sm:$0xff] }
  0x1b   : > { %4723 = vmatpush3.bf16.msra.mxu0 %v5309_v17  ;;  %4597 = vmatprep.subr.bf16.mxu1 %v4596_v22  ;;  %6450 = vst [vmem:[#allocation8_spill] sm:$0xff] %v5383_v43  ;;  %v4744_v55 = vpack.c.bf16 %v3270_v53, %v3269_v52  ;;  %v3272_v57 = vld [vmem:[%s6416_s1 + $0x298] sm:$0xff]  ;;  %v218_v58 = vld [vmem:[%s5326_s28 + $0x8] sm:$0xff]  ;;  %v3111_v59 = vld [vmem:[%s6416_s1 + $0x90] sm:$0xff] }
  0x1c   : > { %4725 = vmatprep.subr.bf16.mxu0 %v5330_v23  ;;  %6451 = vst [vmem:[#allocation9_spill] sm:$0xff] %v5399_v49  ;;  %v3112_v60 = vld [vmem:[%s6416_s1 + $0x98] sm:$0xff]  ;;  %v5430_v61 = vld [vmem:[%s5326_s28 + $0x21] sm:$0xff]  ;;  %v4748_v63 = vpack.c.bf16 %v3272_v57, %v3271_v56  ;;  %v5454_v9 = vld [vmem:[%s5326_s28 + $0x30] sm:$0xff] }
  0x1d   : > { %v219_v62 = vld [vmem:[%s5326_s28 + $0x18] sm:$0xff]  ;;  %v4620_v1 = vpack.c.bf16 %v3112_v60, %v3111_v59  ;;  %v3273_v2 = vld [vmem:[%s6416_s1 + $0x2a0] sm:$0xff]  ;;  %v3274_v3 = vld [vmem:[%s6416_s1 + $0x2a8] sm:$0xff] }
  0x1e   : > { %4599 = vmatpush3.bf16.msra.mxu1 %v4596_v22  ;;  %v5434_v0 = vld [vmem:[%s5326_s28 + $0x31] sm:$0xff]  ;;  %v220_v4 = vld [vmem:[%s5326_s28 + $0x20] sm:$0xff]  ;;  %v3114_v6 = vld [vmem:[%s6416_s1 + $0xa8] sm:$0xff]  ;;  %v4752_v11 = vpack.c.bf16 %v3274_v3, %v3273_v2 }
  0x1f   : > { %4727 = vmatpush3.bf16.msra.mxu0 %v5330_v23  ;;  %4601 = vmatprep.subr.bf16.mxu1 %v4600_v30  ;;  %v3113_v5 = vld [vmem:[%s6416_s1 + $0xa0] sm:$0xff]  ;;  %v5458_v10 = vld [vmem:[%s5326_s28 + $0x49] sm:$0xff]  ;;  %v3276_v14 = vld [vmem:[%s6416_s1 + $0x2b8] sm:$0xff] }
  0x20   : > { %4729 = vmatprep.subr.bf16.mxu0 %v5351_v31  ;;  %v5451_v8 = vld [vmem:[%s5326_s28 + $0x39] sm:$0xff]  ;;  %v3275_v13 = vld [vmem:[%s6416_s1 + $0x2b0] sm:$0xff]  ;;  %v4624_v15 = vpack.c.bf16 %v3114_v6, %v3113_v5  ;;  %v5482_v21 = vld [vmem:[%s5326_s28 + $0x48] sm:$0xff] }
  0x21   : > { %v5469_v16 = vld [vmem:[%s5326_s28 + $0x38] sm:$0xff]  ;;  %v3115_v18 = vld [vmem:[%s6416_s1 + $0xb0] sm:$0xff]  ;;  %v5485_v22 = vld [vmem:[%s5326_s28 + $0x61] sm:$0xff]  ;;  %v4756_v24 = vpack.c.bf16 %v3276_v14, %v3275_v13 }
  0x22   : > { %4603 = vmatpush3.bf16.msra.mxu1 %v4600_v30  ;;  %v3116_v19 = vld [vmem:[%s6416_s1 + $0xb8] sm:$0xff]  ;;  %v3277_v25 = vld [vmem:[%s6416_s1 + $0x2c0] sm:$0xff]  ;;  %v3278_v26 = vld [vmem:[%s6416_s1 + $0x2c8] sm:$0xff] }
  0x23   : > { %4731 = vmatpush3.bf16.msra.mxu0 %v5351_v31  ;;  %4605 = vmatprep.subr.bf16.mxu1 %v4604_v36  ;;  %v5479_v20 = vld [vmem:[%s5326_s28 + $0x51] sm:$0xff]  ;;  %v4628_v27 = vpack.c.bf16 %v3116_v19, %v3115_v18  ;;  %v3117_v30 = vld [vmem:[%s6416_s1 + $0xc0] sm:$0xff]  ;;  %v3118_v32 = vld [vmem:[%s6416_s1 + $0xc8] sm:$0xff] }
  0x24   : > { %4733 = vmatprep.subr.bf16.mxu0 %v5367_v37  ;;  %v5497_v28 = vld [vmem:[%s5326_s28 + $0x50] sm:$0xff]  ;;  %v5510_v34 = vld [vmem:[%s5326_s28 + $0x60] sm:$0xff]  ;;  %v3280_v39 = vld [vmem:[%s6416_s1 + $0x2d8] sm:$0xff]  ;;  %v4632_v40 = vpack.c.bf16 %v3118_v32, %v3117_v30 }
  0x25   : > { %v5507_v33 = vld [vmem:[%s5326_s28 + $0x69] sm:$0xff]  ;;  %v5513_v35 = vld [vmem:[%s5326_s28 + $0x79] sm:$0xff]  ;;  %v5535_v45 = vld [vmem:[%s5326_s28 + $0x81] sm:$0xff] }
  0x26   : > { %4607 = vmatpush3.bf16.msra.mxu1 %v4604_v36  ;;  %v4760_v36 = vpack.c.bf16 %v3278_v26, %v3277_v25  ;;  %v3279_v38 = vld [vmem:[%s6416_s1 + $0x2d0] sm:$0xff]  ;;  %v5525_v41 = vld [vmem:[%s5326_s28 + $0x68] sm:$0xff]  ;;  %v3120_v44 = vld [vmem:[%s6416_s1 + $0xd8] sm:$0xff] }
  0x27   : > { %4735 = vmatpush3.bf16.msra.mxu0 %v5367_v37  ;;  %4609 = vmatprep.subr.bf16.mxu1 %v4608_v42  ;;  %v5538_v46 = vld [vmem:[%s5326_s28 + $0x78] sm:$0xff]  ;;  %v3281_v50 = vld [vmem:[%s6416_s1 + $0x2e0] sm:$0xff]  ;;  %v3282_v51 = vld [vmem:[%s6416_s1 + $0x2e8] sm:$0xff] }
  0x28   : > { %4737 = vmatprep.subr.bf16.mxu0 %v5383_v43  ;;  %v5541_v47 = vld [vmem:[%s5326_s28 + $0x91] sm:$0xff]  ;;  %v5553_v53 = vld [vmem:[%s5326_s28 + $0x80] sm:$0xff]  ;;  %v4768_v59 = vpack.c.bf16 %v3282_v51, %v3281_v50  ;;  %v5594_v5 = vld [vmem:[%s5326_s28 + $0xa8] sm:$0xff] }
  0x29   : > { %v5563_v56 = vld [vmem:[%s5326_s28 + $0x99] sm:$0xff]  ;;  %v5566_v57 = vld [vmem:[%s5326_s28 + $0x90] sm:$0xff]  ;;  %v5597_v6 = vld [vmem:[%s5326_s28 + $0xc1] sm:$0xff] }
  0x2a   : > { %4611 = vmatpush3.bf16.msra.mxu1 %v4608_v42  ;;  %v3119_v42 = vld [vmem:[%s6416_s1 + $0xd0] sm:$0xff]  ;;  %v3124_v3 = vld [vmem:[%s6416_s1 + $0xf8] sm:$0xff]  ;;  %v3317_v13 = vld [vmem:[%s6416_s1 + $0x300] sm:$0xff] }
  0x2b   : > { %4739 = vmatpush3.bf16.msra.mxu0 %v5383_v43  ;;  %4613 = vmatprep.subr.bf16.mxu1 %v4612_v48  ;;  %v4636_v52 = vpack.c.bf16 %v3120_v44, %v3119_v42  ;;  %v3283_v60 = vld [vmem:[%s6416_s1 + $0x2f0] sm:$0xff]  ;;  %v3318_v14 = vld [vmem:[%s6416_s1 + $0x308] sm:$0xff]  ;;  %v3125_v19 = vld [vmem:[%s6416_s1 + $0x100] sm:$0xff] }
  0x2c   : > { %4741 = vmatprep.subr.bf16.mxu0 %v5399_v49  ;;  %v3123_v2 = vld [vmem:[%s6416_s1 + $0xf0] sm:$0xff]  ;;  %v5622_v26 = vld [vmem:[%s5326_s28 + $0xc0] sm:$0xff]  ;;  %v4776_v30 = vpack.c.bf16 %v3318_v14, %v3317_v13  ;;  %v5646_v42 = vld [vmem:[%s5326_s28 + $0xd8] sm:$0xff] }
  0x2d   : > { %v5609_v18 = vld [vmem:[%s5326_s28 + $0xb0] sm:$0xff]  ;;  %v3321_v50 = vld [vmem:[%s6416_s1 + $0x320] sm:$0xff]  ;;  %v3322_v51 = vld [vmem:[%s6416_s1 + $0x328] sm:$0xff] }
  0x2e   : > { %4615 = vmatpush3.bf16.msra.mxu1 %v4612_v48  ;;  %v4764_v48 = vpack.c.bf16 %v3280_v39, %v3279_v38  ;;  %v5619_v25 = vld [vmem:[%s5326_s28 + $0xc9] sm:$0xff]  ;;  %v5649_v44 = vld [vmem:[%s5326_s28 + $0x32] sm:$0xff] }
  0x2f   : > { %4743 = vmatpush3.bf16.msra.mxu0 %v5399_v49  ;;  %4617 = vmatprep.subr.bf16.mxu1 %v4616_v54  ;;  %v3319_v32 = vld [vmem:[%s6416_s1 + $0x310] sm:$0xff]  ;;  %v5639_v39 = vld [vmem:[%s5326_s28 + $0xc8] sm:$0xff]  ;;  %v3329_v49 = vld [vmem:[%s6416_s1 + $0x360] sm:$0xff] }
  0x30   : > { %4745 = vmatprep.subr.bf16.mxu0 %v4744_v55  ;;  %v5694_v13 = vld [vmem:[%s5326_s28 + $0x62] sm:$0xff]  ;;  %v5760_v37 = vld [vmem:[%s5326_s28 + $0xaa] sm:$0xff]  ;;  %v3332_v17 = vld [vmem:[%s6416_s1 + $0x378] sm:$0xff] }
  0x31   : > { %3897 = vmatmul.mubr.f32.vlgmr.msra.gmra.mrb[0].mxu1 %v218_v58  ;;  %v5569_v58 = vld [vmem:[%s5326_s28 + $0xa9] sm:$0xff]  ;;  %6455 = vst [vmem:[#allocation13_spill] sm:$0xff] %v5760_v37 }
  0x32   : > { %4217 = vmatmul.mubr.f32.vlgmr.msra.gmra.mrb[0].mxu0 %v5430_v61  ;;  %4619 = vmatpush3.bf16.msra.mxu1 %v4616_v54  ;;  %v3121_v54 = vld [vmem:[%s6416_s1 + $0xe0] sm:$0xff]  ;;  %v3330_v43 = vld [vmem:[%s6416_s1 + $0x368] sm:$0xff]  ;;  %v3331_v23 = vld [vmem:[%s6416_s1 + $0x370] sm:$0xff] }
  0x33   : > { %4747 = vmatpush3.bf16.msra.mxu0 %v4744_v55  ;;  %3899 = vmatprep.mubr.f32.mxu1 %v219_v62  ;;  %v3122_v55 = vld [vmem:[%s6416_s1 + $0xe8] sm:$0xff]  ;;  %v3284_v62 = vld [vmem:[%s6416_s1 + $0x2f8] sm:$0xff]  ;;  %v4800_v31 = vpack.c.bf16 %v3330_v43, %v3329_v49  ;;  %v4804_v7 = vpack.c.bf16 %v3332_v17, %v3331_v23 }
  0x34   : > { %4219 = vmatprep.mubr.f32.mxu0 %v5434_v0  ;;  %4749 = vmatprep.subr.bf16.mxu0 %v4748_v63  ;;  %v5776_v43 = vld [vmem:[%s5326_s28 + $0xb2] sm:$0xff]  ;;  %v5779_v49 = vld [vmem:[%s5326_s28 + $0x168] sm:$0xff] }
  0x35   : > { %3900 = vmatmul.mubr.f32.gmra.mrb[2].mxu1 %v220_v4  ;;  %4621 = vmatprep.subr.bf16.mxu1 %v4620_v1  ;;  %v5591_v4 = vld [vmem:[%s5326_s28 + $0xb1] sm:$0xff]  ;;  %6456 = vst [vmem:[#allocation14_spill] sm:$0xff] %v5776_v43  ;;  %6457 = vst [vmem:[#allocation15_spill] sm:$0xff] %v5779_v49  ;;  %v5782_v12 = vld [vmem:[%s5326_s28 + $0xc2] sm:$0xff] }
  0x36   : > { %4220 = vmatmul.mubr.f32.gmra.mrb[2].mxu0 %v5451_v8  ;;  %3902 = vmatprep.mubr.f32.mxu1 %v5454_v9  ;;  %6458 = vst [vmem:[#allocation16_spill] sm:$0xff] %v5782_v12  ;;  %v5798_v17 = vld [vmem:[%s5326_s28 + $0xca] sm:$0xff]  ;;  %v522_v23 = vld [vmem:[%s5326_s28 + $0x1] sm:$0xff] }
  0x37   : > { %4751 = vmatpush3.bf16.msra.mxu0 %v4748_v63  ;;  %4222 = vmatprep.mubr.f32.mxu0 %v5458_v10  ;;  %v4640_v63 = vpack.c.bf16 %v3122_v55, %v3121_v54  ;;  %v5666_v54 = vld [vmem:[%s5326_s28 + $0x3a] sm:$0xff]  ;;  %v5669_v55 = vld [vmem:[%s5326_s28 + $0xf0] sm:$0xff] }
  0x38   : > { %4753 = vmatprep.subr.bf16.mxu0 %v4752_v11  ;;  %4623 = vmatpush3.bf16.msra.mxu1 %v4620_v1  ;;  %v5581_v1 = vld [vmem:[%s5326_s28 + $0x98] sm:$0xff] }
  0x39   : > { %3903 = vmatmul.mubr.f32.gmra.mrb[4].mxu1 %v5469_v16  ;;  %4625 = vmatprep.subr.bf16.mxu1 %v4624_v15 }
  0x3a   : > { %4223 = vmatmul.mubr.f32.gmra.mrb[4].mxu0 %v5479_v20  ;;  %3905 = vmatprep.mubr.f32.mxu1 %v5482_v21 }
  0x3b   : > { %4755 = vmatpush3.bf16.msra.mxu0 %v4752_v11  ;;  %4225 = vmatprep.mubr.f32.mxu0 %v5485_v22  ;;  %v4772_v11 = vpack.c.bf16 %v3284_v62, %v3283_v60  ;;  %v4784_v60 = vpack.c.bf16 %v3322_v51, %v3321_v50  ;;  %v3323_v62 = vld [vmem:[%s6416_s1 + $0x330] sm:$0xff]  ;;  %v3328_v51 = vld [vmem:[%s6416_s1 + $0x358] sm:$0xff] }
  0x3c   : > { %4757 = vmatprep.subr.bf16.mxu0 %v4756_v24  ;;  %4627 = vmatpush3.bf16.msra.mxu1 %v4624_v15  ;;  %v4644_v15 = vpack.c.bf16 %v3124_v3, %v3123_v2  ;;  %v5684_v2 = vld [vmem:[%s5326_s28 + $0xf8] sm:$0xff]  ;;  %v3327_v50 = vld [vmem:[%s6416_s1 + $0x350] sm:$0xff] }
  0x3d   : > { %3906 = vmatmul.mubr.f32.gmra.mrb[6].mxu1 %v5497_v28  ;;  %4629 = vmatprep.subr.bf16.mxu1 %v4628_v27  ;;  %v5688_v3 = vld [vmem:[%s5326_s28 + $0x52] sm:$0xff] }
  0x3e   : > { %4226 = vmatmul.mubr.f32.gmra.mrb[6].mxu0 %v5507_v33  ;;  %3908 = vmatprep.mubr.f32.mxu1 %v5510_v34 }
  0x3f   : > { %4759 = vmatpush3.bf16.msra.mxu0 %v4756_v24  ;;  %4228 = vmatprep.mubr.f32.mxu0 %v5513_v35  ;;  %v3126_v24 = vld [vmem:[%s6416_s1 + $0x108] sm:$0xff] }
  0x40   : > { %4761 = vmatprep.subr.bf16.mxu0 %v4760_v36  ;;  %4631 = vmatpush3.bf16.msra.mxu1 %v4628_v27  ;;  %v5625_v27 = vld [vmem:[%s5326_s28 + $0x1a] sm:$0xff]  ;;  %v5634_v38 = vpack.c.bf16 %v3126_v24, %v3125_v19  ;;  %v3326_v19 = vld [vmem:[%s6416_s1 + $0x348] sm:$0xff]  ;;  %v5706_v24 = vld [vmem:[%s5326_s28 + $0x110] sm:$0xff] }
  0x41   : > { %3909 = vmatmul.mubr.f32.gmra.mrb[8].mxu1 %v5525_v41  ;;  %4633 = vmatprep.subr.bf16.mxu1 %v4632_v40 }
  0x42   : > { %4229 = vmatmul.mubr.f32.gmra.mrb[8].mxu0 %v5535_v45  ;;  %3911 = vmatprep.mubr.f32.mxu1 %v5538_v46 }
  0x43   : > { %4763 = vmatpush3.bf16.msra.mxu0 %v4760_v36  ;;  %4231 = vmatprep.mubr.f32.mxu0 %v5541_v47  ;;  %v3320_v36 = vld [vmem:[%s6416_s1 + $0x318] sm:$0xff] }
  0x44   : > { %4765 = vmatprep.subr.bf16.mxu0 %v4764_v48  ;;  %4635 = vmatpush3.bf16.msra.mxu1 %v4632_v40  ;;  %v5643_v40 = vld [vmem:[%s5326_s28 + $0x22] sm:$0xff] }
  0x45   : > { %3912 = vmatmul.mubr.f32.gmra.mrb[10].mxu1 %v5553_v53  ;;  %4637 = vmatprep.subr.bf16.mxu1 %v4636_v52 }
  0x46   : > { %4232 = vmatmul.mubr.f32.gmra.mrb[10].mxu0 %v5563_v56  ;;  %3914 = vmatprep.mubr.f32.mxu1 %v5566_v57 }
  0x47   : > { %4767 = vmatpush3.bf16.msra.mxu0 %v4764_v48  ;;  %4234 = vmatprep.mubr.f32.mxu0 %v5569_v58  ;;  %v4780_v48 = vpack.c.bf16 %v3320_v36, %v3319_v32  ;;  %v5713_v32 = vld [vmem:[%s5326_s28 + $0x120] sm:$0xff] }
  0x48   : > { %4769 = vmatprep.subr.bf16.mxu0 %v4768_v59  ;;  %4639 = vmatpush3.bf16.msra.mxu1 %v4636_v52  ;;  %v5662_v52 = vld [vmem:[%s5326_s28 + $0xe0] sm:$0xff] }
  0x49   : > { %3915 = vmatmul.mubr.f32.gmra.mrb[12].mxu1 %v5581_v1  ;;  %4641 = vmatprep.subr.bf16.mxu1 %v4640_v63  ;;  %v5716_v36 = vld [vmem:[%s5326_s28 + $0x7a] sm:$0xff] }
  0x4a   : > { %4235 = vmatmul.mubr.f32.gmra.mrb[12].mxu0 %v5591_v4  ;;  %3917 = vmatprep.mubr.f32.mxu1 %v5594_v5 }
  0x4b   : > { %4771 = vmatpush3.bf16.msra.mxu0 %v4768_v59  ;;  %4237 = vmatprep.mubr.f32.mxu0 %v5597_v6  ;;  %v5672_v59 = vld [vmem:[%s5326_s28 + $0x4a] sm:$0xff] }
  0x4c   : > { %4773 = vmatprep.subr.bf16.mxu0 %v4772_v11  ;;  %4643 = vmatpush3.bf16.msra.mxu1 %v4640_v63  ;;  %v3324_v63 = vld [vmem:[%s6416_s1 + $0x338] sm:$0xff] }
  0x4d   : > { %3918 = vmatmul.mubr.f32.gmra.mrb[14].mxu1 %v5609_v18  ;;  %4645 = vmatprep.subr.bf16.mxu1 %v4644_v15  ;;  %v4788_v14 = vpack.c.bf16 %v3324_v63, %v3323_v62  ;;  %v5732_v62 = vld [vmem:[%s5326_s28 + $0x82] sm:$0xff]  ;;  %v5735_v63 = vld [vmem:[%s5326_s28 + $0x138] sm:$0xff] }
  0x4e   : > { %4238 = vmatmul.mubr.f32.gmra.mrb[14].mxu0 %v5619_v25  ;;  %3920 = vmatprep.mubr.f32.mxu1 %v5622_v26  ;;  %6452 = vst [vmem:[#allocation10_spill] sm:$0xff] %v5732_v62 }
  0x4f   : > { %4775 = vmatpush3.bf16.msra.mxu0 %v4772_v11  ;;  %4296 = vmatprep.mubr.f32.mxu0 %v5625_v27  ;;  %v5691_v11 = vld [vmem:[%s5326_s28 + $0x108] sm:$0xff] }
  0x50   : > { %4777 = vmatprep.subr.bf16.mxu0 %v4776_v30  ;;  %4647 = vmatpush3.bf16.msra.mxu1 %v4644_v15  ;;  %v3325_v15 = vld [vmem:[%s6416_s1 + $0x340] sm:$0xff] }
  0x51   : > { %3921 = vmatmul.mubr.f32.gmra.mrb[16].mxu1 %v5639_v39  ;;  %4649 = vmatprep.subr.bf16.mxu1 %v5634_v38 }
  0x52   : > { %4297 = vmatmul.mubr.f32.vlgmr.msra.gmra.mrb[0].mxu0 %v5643_v40  ;;  %3923 = vmatprep.mubr.f32.mxu1 %v5646_v42 }
  0x53   : > { %4299 = vmatprep.mubr.f32.mxu0 %v5649_v44  ;;  %4779 = vmatpush3.bf16.msra.mxu0 %v4776_v30  ;;  %v5710_v30 = vld [vmem:[%s5326_s28 + $0x6a] sm:$0xff] }
  0x54   : > { %4781 = vmatprep.subr.bf16.mxu0 %v4780_v48 }
  0x55   : > { %3924 = vmatmul.mubr.f32.gmra.mrb[18].mxu1 %v5662_v52 }
  0x56   : > { %4300 = vmatmul.mubr.f32.gmra.mrb[2].mxu0 %v5666_v54  ;;  %3926 = vmatprep.mubr.f32.mxu1 %v5669_v55 }
  0x57   : > { %4302 = vmatprep.mubr.f32.mxu0 %v5672_v59  ;;  %4783 = vmatpush3.bf16.msra.mxu0 %v4780_v48  ;;  %v4792_v48 = vpack.c.bf16 %v3326_v19, %v3325_v15  ;;  %v5738_v15 = vld [vmem:[%s5326_s28 + $0x92] sm:$0xff]  ;;  %v4796_v19 = vpack.c.bf16 %v3328_v51, %v3327_v50  ;;  %v5754_v50 = vld [vmem:[%s5326_s28 + $0x9a] sm:$0xff] }
  0x58   : > { %4785 = vmatprep.subr.bf16.mxu0 %v4784_v60  ;;  %6453 = vst [vmem:[#allocation11_spill] sm:$0xff] %v5738_v15  ;;  %6454 = vst [vmem:[#allocation12_spill] sm:$0xff] %v5754_v50  ;;  %v5757_v51 = vld [vmem:[%s5326_s28 + $0x150] sm:$0xff] }
  0x59   : > { %3927 = vmatmul.mubr.f32.gmra.mrb[20].mxu1 %v5684_v2 }
  0x5a   : > { %4303 = vmatmul.mubr.f32.gmra.mrb[4].mxu0 %v5688_v3  ;;  %3929 = vmatprep.mubr.f32.mxu1 %v5691_v11 }
  0x5b   : > { %4305 = vmatprep.mubr.f32.mxu0 %v5694_v13  ;;  %4787 = vmatpush3.bf16.msra.mxu0 %v4784_v60  ;;  %v5728_v60 = vld [vmem:[%s5326_s28 + $0x128] sm:$0xff] }
  0x5c   : > { %4789 = vmatprep.subr.bf16.mxu0 %v4788_v14 }
  0x5d   : > { %3930 = vmatmul.mubr.f32.gmra.mrb[22].mxu1 %v5706_v24 }
  0x5e   : > { %4306 = vmatmul.mubr.f32.gmra.mrb[6].mxu0 %v5710_v30  ;;  %3932 = vmatprep.mubr.f32.mxu1 %v5713_v32 }
  0x5f   : > { %4308 = vmatprep.mubr.f32.mxu0 %v5716_v36  ;;  %4791 = vmatpush3.bf16.msra.mxu0 %v4788_v14  ;;  %v5750_v14 = vld [vmem:[%s5326_s28 + $0x140] sm:$0xff] }
  0x60   : > { %4793 = vmatprep.subr.bf16.mxu0 %v4792_v48 }
  0x61   : > { %3933 = vmatmul.mubr.f32.gmra.mrb[24].mxu1 %v5728_v60 }
  0x62   : > { %4309 = vmatmul.mubr.f32.gmra.mrb[8].mxu0 %v5732_v62  ;;  %3935 = vmatprep.mubr.f32.mxu1 %v5735_v63 }
  0x63   : > { %4311 = vmatprep.mubr.f32.mxu0 %v5738_v15  ;;  %4795 = vmatpush3.bf16.msra.mxu0 %v4792_v48  ;;  %v5772_v48 = vld [vmem:[%s5326_s28 + $0x158] sm:$0xff] }
  0x64   : > { %4797 = vmatprep.subr.bf16.mxu0 %v4796_v19  ;;  %v5802_v15 = vld [vmem:[%s5326_s28 + $0xda] sm:$0xff] }
  0x65   : > { %3936 = vmatmul.mubr.f32.gmra.mrb[26].mxu1 %v5750_v14 }
  0x66   : > { %4312 = vmatmul.mubr.f32.gmra.mrb[10].mxu0 %v5754_v50  ;;  %3938 = vmatprep.mubr.f32.mxu1 %v5757_v51  ;;  %v3365_v50 = vld [vmem:[%s6416_s1 + $0x380] sm:$0xff] }
  0x67   : > { %4314 = vmatprep.mubr.f32.mxu0 %v5760_v37  ;;  %4799 = vmatpush3.bf16.msra.mxu0 %v4796_v19  ;;  %v3366_v37 = vld [vmem:[%s6416_s1 + $0x388] sm:$0xff]  ;;  %v5794_v19 = vld [vmem:[%s5326_s28 + $0x170] sm:$0xff] }
  0x68   : > { %4801 = vmatprep.subr.bf16.mxu0 %v4800_v31  ;;  %6459 = vst [vmem:[#allocation17_spill] sm:$0xff] %v5794_v19  ;;  %v5804_v62 = vpack.c.bf16 %v3366_v37, %v3365_v50  ;;  %v5817_v37 = vld [vmem:[%s5326_s28 + $0xe2] sm:$0xff]  ;;  %v5820_v50 = vld [vmem:[%s5326_s28 + $0xf2] sm:$0xff] }
  0x69   : > { %3939 = vmatmul.mubr.f32.gmra.mrb[28].mxu1 %v5772_v48 }
  0x6a   : > { %4315 = vmatmul.mubr.f32.gmra.mrb[12].mxu0 %v5776_v43  ;;  %3941 = vmatprep.mubr.f32.mxu1 %v5779_v49  ;;  %v3127_v43 = vld [vmem:[%s6416_s1 + $0x110] sm:$0xff]  ;;  %v3129_v49 = vld [vmem:[%s6416_s1 + $0x120] sm:$0xff] }
  0x6b   : > { %4317 = vmatprep.mubr.f32.mxu0 %v5782_v12  ;;  %4803 = vmatpush3.bf16.msra.mxu0 %v4800_v31  ;;  %v3128_v12 = vld [vmem:[%s6416_s1 + $0x118] sm:$0xff]  ;;  %v523_v31 = vld [vmem:[%s5326_s28 + $0x9] sm:$0xff] }
  0x6c   : > { %4805 = vmatprep.subr.bf16.mxu0 %v4804_v7 }
  0x6d   : > { %3942 = vmatmul.mubr.f32.gmra.mrb[30].mxu1 %v5794_v19  ;;  %v4652_v19 = vpack.c.bf16 %v3128_v12, %v3127_v43  ;;  %v5837_v12 = vld [vmem:[%s5326_s28 + $0x10a] sm:$0xff] }
  0x6e   : > { %4318 = vmatmul.mubr.f32.gmra.mrb[14].mxu0 %v5798_v17  ;;  %3976 = vmatprep.mubr.f32.mxu1 %v522_v23  ;;  %v3130_v23 = vld [vmem:[%s6416_s1 + $0x128] sm:$0xff] }
  0x6f   : > { %4320 = vmatprep.mubr.f32.mxu0 %v5802_v15  ;;  %4807 = vmatpush3.bf16.msra.mxu0 %v4804_v7  ;;  %v5834_v7 = vld [vmem:[%s5326_s28 + $0xfa] sm:$0xff]  ;;  %v4656_v43 = vpack.c.bf16 %v3130_v23, %v3129_v49 }
  0x70   : > { %4809 = vmatprep.subr.bf16.mxu0 %v5804_v62  ;;  %v3133_v23 = vld [vmem:[%s6416_s1 + $0x140] sm:$0xff] }
  0x71   : > { %3977 = vmatmul.mubr.f32.vlgmr.msra.gmra.mrb[0].mxu1 %v523_v31  ;;  %v3131_v31 = vld [vmem:[%s6416_s1 + $0x130] sm:$0xff] }
  0x72   : > { %4321 = vmatmul.mubr.f32.gmra.mrb[16].mxu0 %v5817_v37  ;;  %4651 = vmatpush3.bf16.msra.mxu1 %v5634_v38  ;;  %v3132_v38 = vld [vmem:[%s6416_s1 + $0x138] sm:$0xff] }
  0x73   : > { %3979 = vmatprep.mubr.f32.mxu1 %v5346_v29  ;;  %4323 = vmatprep.mubr.f32.mxu0 %v5820_v50  ;;  %v5850_v29 = vld [vmem:[%s5326_s28 + $0x112] sm:$0xff]  ;;  %v4660_v49 = vpack.c.bf16 %v3132_v38, %v3131_v31 }
  0x74   : > { %4653 = vmatprep.subr.bf16.mxu1 %v4652_v19  ;;  %v3135_v38 = vld [vmem:[%s6416_s1 + $0x150] sm:$0xff] }
  0x75   : > { %3980 = vmatmul.mubr.f32.gmra.mrb[2].mxu1 %v5430_v61  ;;  %v5853_v61 = vld [vmem:[%s5326_s28 + $0x122] sm:$0xff] }
  0x76   : > { %4324 = vmatmul.mubr.f32.gmra.mrb[18].mxu0 %v5834_v7  ;;  %3982 = vmatprep.mubr.f32.mxu1 %v5434_v0  ;;  %v3134_v0 = vld [vmem:[%s6416_s1 + $0x148] sm:$0xff] }
  0x77   : > { %4326 = vmatprep.mubr.f32.mxu0 %v5837_v12  ;;  %4655 = vmatpush3.bf16.msra.mxu1 %v4652_v19  ;;  %v5866_v19 = vld [vmem:[%s5326_s28 + $0x12a] sm:$0xff]  ;;  %v4664_v31 = vpack.c.bf16 %v3134_v0, %v3133_v23  ;;  %v3137_v0 = vld [vmem:[%s6416_s1 + $0x160] sm:$0xff] }
  0x78   : > { %4657 = vmatprep.subr.bf16.mxu1 %v4656_v43 }
  0x79   : > { %3983 = vmatmul.mubr.f32.gmra.mrb[4].mxu1 %v5451_v8  ;;  %v5869_v8 = vld [vmem:[%s5326_s28 + $0x13a] sm:$0xff] }
  0x7a   : > { %4327 = vmatmul.mubr.f32.gmra.mrb[20].mxu0 %v5850_v29  ;;  %3985 = vmatprep.mubr.f32.mxu1 %v5458_v10  ;;  %v3136_v10 = vld [vmem:[%s6416_s1 + $0x158] sm:$0xff] }
  0x7b   : > { %4329 = vmatprep.mubr.f32.mxu0 %v5853_v61  ;;  %4659 = vmatpush3.bf16.msra.mxu1 %v4656_v43  ;;  %v5882_v43 = vld [vmem:[%s5326_s28 + $0x142] sm:$0xff]  ;;  %v4668_v23 = vpack.c.bf16 %v3136_v10, %v3135_v38  ;;  %v3139_v10 = vld [vmem:[%s6416_s1 + $0x170] sm:$0xff] }
  0x7c   : > { %4661 = vmatprep.subr.bf16.mxu1 %v4660_v49 }
  0x7d   : > { %3986 = vmatmul.mubr.f32.gmra.mrb[6].mxu1 %v5479_v20  ;;  %v5885_v20 = vld [vmem:[%s5326_s28 + $0x152] sm:$0xff] }
  0x7e   : > { %4330 = vmatmul.mubr.f32.gmra.mrb[22].mxu0 %v5866_v19  ;;  %3988 = vmatprep.mubr.f32.mxu1 %v5485_v22  ;;  %v3138_v22 = vld [vmem:[%s6416_s1 + $0x168] sm:$0xff] }
  0x7f   : > { %4332 = vmatprep.mubr.f32.mxu0 %v5869_v8  ;;  %4663 = vmatpush3.bf16.msra.mxu1 %v4660_v49  ;;  %v5898_v49 = vld [vmem:[%s5326_s28 + $0x15a] sm:$0xff]  ;;  %v4672_v38 = vpack.c.bf16 %v3138_v22, %v3137_v0  ;;  %v3267_v0 = vld [vmem:[%s5326_s28 + $0x182] sm:$0xff] }
  0x80   : > { %4665 = vmatprep.subr.bf16.mxu1 %v4664_v31  ;;  %6460 = vst [vmem:[#allocation18_spill] sm:$0xff] %v5898_v49  ;;  %v3173_v22 = vld [vmem:[%s6416_s1 + $0x180] sm:$0xff] }
  0x81   : > { %3989 = vmatmul.mubr.f32.gmra.mrb[8].mxu1 %v5507_v33  ;;  %v5901_v33 = vld [vmem:[%s5326_s28 + $0x16a] sm:$0xff] }
  0x82   : > { %4333 = vmatmul.mubr.f32.gmra.mrb[24].mxu0 %v5882_v43  ;;  %3991 = vmatprep.mubr.f32.mxu1 %v5513_v35  ;;  %v3140_v35 = vld [vmem:[%s6416_s1 + $0x178] sm:$0xff] }
  0x83   : > { %4335 = vmatprep.mubr.f32.mxu0 %v5885_v20  ;;  %4667 = vmatpush3.bf16.msra.mxu1 %v4664_v31  ;;  %v5914_v31 = vld [vmem:[%s5326_s28 + $0x172] sm:$0xff] }
  0x84   : > { %4669 = vmatprep.subr.bf16.mxu1 %v4668_v23 }
  0x85   : > { %3992 = vmatmul.mubr.f32.gmra.mrb[10].mxu1 %v5535_v45  ;;  %v4676_v45 = vpack.c.bf16 %v3140_v35, %v3139_v10  ;;  %v3368_v35 = vld [vmem:[%s6416_s1 + $0x398] sm:$0xff] }
  0x86   : > { %4336 = vmatmul.mubr.f32.gmra.mrb[26].mxu0 %v5898_v49  ;;  %3994 = vmatprep.mubr.f32.mxu1 %v5541_v47  ;;  %v3174_v49 = vld [vmem:[%s6416_s1 + $0x188] sm:$0xff] }
  0x87   : > { %4338 = vmatprep.mubr.f32.mxu0 %v5901_v33  ;;  %4671 = vmatpush3.bf16.msra.mxu1 %v4668_v23  ;;  %v3268_v23 = vld [vmem:[%s5326_s28 + $0x18a] sm:$0xff]  ;;  %v5927_v10 = vpack.c.bf16 %v3174_v49, %v3173_v22 }
  0x88   : > { %4673 = vmatprep.subr.bf16.mxu1 %v4672_v38  ;;  %v3371_v22 = vld [vmem:[%s6416_s1 + $0x3b0] sm:$0xff] }
  0x89   : > { %3995 = vmatmul.mubr.f32.gmra.mrb[12].mxu1 %v5563_v56  ;;  %v3367_v56 = vld [vmem:[%s6416_s1 + $0x390] sm:$0xff] }
  0x8a   : > { %4339 = vmatmul.mubr.f32.gmra.mrb[28].mxu0 %v5914_v31  ;;  %3997 = vmatprep.mubr.f32.mxu1 %v5569_v58  ;;  %v5939_v58 = vld [vmem:[%s5326_s28 + $0xd9] sm:$0xff]  ;;  %v4812_v49 = vpack.c.bf16 %v3368_v35, %v3367_v56  ;;  %v5989_v35 = vld [vmem:[%s5326_s28 + $0x121] sm:$0xff] }
  0x8b   : > { %4341 = vmatprep.mubr.f32.mxu0 %v3267_v0  ;;  %4675 = vmatpush3.bf16.msra.mxu1 %v4672_v38  ;;  %v3370_v38 = vld [vmem:[%s6416_s1 + $0x3a8] sm:$0xff]  ;;  %v5957_v0 = vld [vmem:[%s5326_s28 + $0xf1] sm:$0xff]  ;;  %v3373_v56 = vld [vmem:[%s6416_s1 + $0x3c0] sm:$0xff] }
  0x8c   : > { %4677 = vmatprep.subr.bf16.mxu1 %v4676_v45 }
  0x8d   : > { %3998 = vmatmul.mubr.f32.gmra.mrb[14].mxu1 %v5591_v4  ;;  %v3369_v4 = vld [vmem:[%s6416_s1 + $0x3a0] sm:$0xff] }
  0x8e   : > { %4342 = vmatmul.mubr.f32.gmra.mrb[30].mxu0 %v3268_v23  ;;  %4000 = vmatprep.mubr.f32.mxu1 %v5597_v6 }
  0x8f   : > { %4376 = vmatprep.mubr.f32.mxu0 %v5454_v9  ;;  %4679 = vmatpush3.bf16.msra.mxu1 %v4676_v45  ;;  %v5952_v9 = vld [vmem:[%s5326_s28 + $0xe1] sm:$0xff]  ;;  %v4816_v45 = vpack.c.bf16 %v3370_v38, %v3369_v4  ;;  %v3375_v4 = vld [vmem:[%s6416_s1 + $0x3d0] sm:$0xff]  ;;  %v6005_v38 = vld [vmem:[%s5326_s28 + $0x139] sm:$0xff] }
  0x90   : > { %4681 = vmatprep.subr.bf16.mxu1 %v5927_v10 }
  0x91   : > { %4001 = vmatmul.mubr.f32.gmra.mrb[16].mxu1 %v5619_v25 }
  0x92   : > { %4377 = vmatmul.mubr.f32.vlgmr.msra.gmra.mrb[0].mxu0 %v5469_v16  ;;  %4003 = vmatprep.mubr.f32.mxu1 %v5939_v58  ;;  %v3372_v16 = vld [vmem:[%s6416_s1 + $0x3b8] sm:$0xff] }
  0x93   : > { %4379 = vmatprep.mubr.f32.mxu0 %v5482_v21  ;;  %4811 = vmatpush3.bf16.msra.mxu0 %v5804_v62  ;;  %v5969_v21 = vld [vmem:[%s5326_s28 + $0xf9] sm:$0xff]  ;;  %v5973_v62 = vld [vmem:[%s5326_s28 + $0x109] sm:$0xff]  ;;  %v4820_v23 = vpack.c.bf16 %v3372_v16, %v3371_v22  ;;  %v6021_v16 = vld [vmem:[%s5326_s28 + $0x151] sm:$0xff] }
  0x94   : > { %4813 = vmatprep.subr.bf16.mxu0 %v4812_v49  ;;  %v3377_v22 = vld [vmem:[%s6416_s1 + $0x3e0] sm:$0xff] }
  0x95   : > { %4004 = vmatmul.mubr.f32.gmra.mrb[18].mxu1 %v5952_v9 }
  0x96   : > { %4380 = vmatmul.mubr.f32.gmra.mrb[2].mxu0 %v5497_v28  ;;  %4006 = vmatprep.mubr.f32.mxu1 %v5957_v0  ;;  %v3374_v28 = vld [vmem:[%s6416_s1 + $0x3c8] sm:$0xff] }
  0x97   : > { %4382 = vmatprep.mubr.f32.mxu0 %v5510_v34  ;;  %4815 = vmatpush3.bf16.msra.mxu0 %v4812_v49  ;;  %v5985_v34 = vld [vmem:[%s5326_s28 + $0x111] sm:$0xff]  ;;  %v4824_v49 = vpack.c.bf16 %v3374_v28, %v3373_v56  ;;  %v6037_v28 = vld [vmem:[%s5326_s28 + $0x169] sm:$0xff] }
  0x98   : > { %4817 = vmatprep.subr.bf16.mxu0 %v4816_v45  ;;  %v3379_v56 = vld [vmem:[%s6416_s1 + $0x3f0] sm:$0xff] }
  0x99   : > { %4007 = vmatmul.mubr.f32.gmra.mrb[20].mxu1 %v5969_v21 }
  0x9a   : > { %4383 = vmatmul.mubr.f32.gmra.mrb[4].mxu0 %v5525_v41  ;;  %4009 = vmatprep.mubr.f32.mxu1 %v5973_v62  ;;  %v3376_v41 = vld [vmem:[%s6416_s1 + $0x3d8] sm:$0xff] }
  0x9b   : > { %4385 = vmatprep.mubr.f32.mxu0 %v5538_v46  ;;  %4819 = vmatpush3.bf16.msra.mxu0 %v4816_v45  ;;  %v6001_v46 = vld [vmem:[%s5326_s28 + $0x129] sm:$0xff]  ;;  %v4828_v45 = vpack.c.bf16 %v3376_v41, %v3375_v4  ;;  %v3413_v4 = vld [vmem:[%s6416_s1 + $0x400] sm:$0xff] }
  0x9c   : > { %4821 = vmatprep.subr.bf16.mxu0 %v4820_v23  ;;  %v828_v41 = vld [vmem:[%s5326_s28 + $0x2] sm:$0xff] }
  0x9d   : > { %4010 = vmatmul.mubr.f32.gmra.mrb[22].mxu1 %v5985_v34 }
  0x9e   : > { %4386 = vmatmul.mubr.f32.gmra.mrb[6].mxu0 %v5553_v53  ;;  %4012 = vmatprep.mubr.f32.mxu1 %v5989_v35  ;;  %v3378_v53 = vld [vmem:[%s6416_s1 + $0x3e8] sm:$0xff] }
  0x9f   : > { %4388 = vmatprep.mubr.f32.mxu0 %v5566_v57  ;;  %4823 = vmatpush3.bf16.msra.mxu0 %v4820_v23  ;;  %v6017_v57 = vld [vmem:[%s5326_s28 + $0x141] sm:$0xff]  ;;  %v4832_v23 = vpack.c.bf16 %v3378_v53, %v3377_v22  ;;  %v3175_v22 = vld [vmem:[%s6416_s1 + $0x190] sm:$0xff] }
  0xa0   : > { %4825 = vmatprep.subr.bf16.mxu0 %v4824_v49  ;;  %v829_v53 = vld [vmem:[%s5326_s28 + $0xa] sm:$0xff] }
  0xa1   : > { %4013 = vmatmul.mubr.f32.gmra.mrb[24].mxu1 %v6001_v46 }
  0xa2   : > { %4389 = vmatmul.mubr.f32.gmra.mrb[8].mxu0 %v5581_v1  ;;  %4015 = vmatprep.mubr.f32.mxu1 %v6005_v38  ;;  %v3380_v1 = vld [vmem:[%s6416_s1 + $0x3f8] sm:$0xff] }
  0xa3   : > { %4391 = vmatprep.mubr.f32.mxu0 %v5594_v5  ;;  %4827 = vmatpush3.bf16.msra.mxu0 %v4824_v49  ;;  %v6033_v5 = vld [vmem:[%s5326_s28 + $0x159] sm:$0xff]  ;;  %v4836_v49 = vpack.c.bf16 %v3380_v1, %v3379_v56  ;;  %v3178_v56 = vld [vmem:[%s6416_s1 + $0x1a8] sm:$0xff] }
  0xa4   : > { %4829 = vmatprep.subr.bf16.mxu0 %v4828_v45  ;;  %v3180_v1 = vld [vmem:[%s6416_s1 + $0x1b8] sm:$0xff] }
  0xa5   : > { %4016 = vmatmul.mubr.f32.gmra.mrb[26].mxu1 %v6017_v57 }
  0xa6   : > { %4392 = vmatmul.mubr.f32.gmra.mrb[10].mxu0 %v5609_v18  ;;  %4018 = vmatprep.mubr.f32.mxu1 %v6021_v16  ;;  %v3414_v18 = vld [vmem:[%s6416_s1 + $0x408] sm:$0xff] }
  0xa7   : > { %4394 = vmatprep.mubr.f32.mxu0 %v5622_v26  ;;  %4831 = vmatpush3.bf16.msra.mxu0 %v4828_v45  ;;  %v6049_v26 = vld [vmem:[%s5326_s28 + $0x171] sm:$0xff]  ;;  %v6053_v45 = vpack.c.bf16 %v3414_v18, %v3413_v4 }
  0xa8   : > { %4833 = vmatprep.subr.bf16.mxu0 %v4832_v23  ;;  %v6465_v4 = vld [vmem:[#allocation12_spill] sm:$0xff]  ;;  %v6466_v18 = vld [vmem:[#allocation13_spill] sm:$0xff] }
  0xa9   : > { %4019 = vmatmul.mubr.f32.gmra.mrb[28].mxu1 %v6033_v5 }
  0xaa   : > { %4395 = vmatmul.mubr.f32.gmra.mrb[12].mxu0 %v5639_v39  ;;  %4021 = vmatprep.mubr.f32.mxu1 %v6037_v28  ;;  %v3176_v39 = vld [vmem:[%s6416_s1 + $0x198] sm:$0xff] }
  0xab   : > { %4397 = vmatprep.mubr.f32.mxu0 %v5646_v42  ;;  %4835 = vmatpush3.bf16.msra.mxu0 %v4832_v23  ;;  %v4684_v42 = vpack.c.bf16 %v3176_v39, %v3175_v22  ;;  %v3177_v23 = vld [vmem:[%s6416_s1 + $0x1a0] sm:$0xff]  ;;  %v3333_v22 = vld [vmem:[%s5326_s28 + $0x31] sm:$0xff] }
  0xac   : > { %4837 = vmatprep.subr.bf16.mxu0 %v4836_v49  ;;  %v6467_v39 = vld [vmem:[#allocation14_spill] sm:$0xff] }
  0xad   : > { %4022 = vmatmul.mubr.f32.gmra.mrb[30].mxu1 %v6049_v26 }
  0xae   : > { %4398 = vmatmul.mubr.f32.gmra.mrb[14].mxu0 %v5662_v52  ;;  %4056 = vmatprep.mubr.f32.mxu1 %v828_v41  ;;  %v4688_v52 = vpack.c.bf16 %v3178_v56, %v3177_v23  ;;  %v3316_v41 = vld [vmem:[%s5326_s28 + $0x1a0] sm:$0xff]  ;;  %v6468_v23 = vld [vmem:[#allocation16_spill] sm:$0xff] }
  0xaf   : > { %4400 = vmatprep.mubr.f32.mxu0 %v5669_v55  ;;  %4839 = vmatpush3.bf16.msra.mxu0 %v4836_v49  ;;  %v3179_v55 = vld [vmem:[%s6416_s1 + $0x1b0] sm:$0xff]  ;;  %v3334_v56 = vld [vmem:[%s5326_s28 + $0x39] sm:$0xff] }
  0xb0   : > { %4841 = vmatprep.subr.bf16.mxu0 %v6053_v45 }
  0xb1   : > { %4057 = vmatmul.mubr.f32.vlgmr.msra.gmra.mrb[0].mxu1 %v829_v53  ;;  %v3415_v53 = vld [vmem:[%s6416_s1 + $0x410] sm:$0xff] }
  0xb2   : > { %4401 = vmatmul.mubr.f32.gmra.mrb[16].mxu0 %v5684_v2  ;;  %4683 = vmatpush3.bf16.msra.mxu1 %v5927_v10  ;;  %v3182_v2 = vld [vmem:[%s6416_s1 + $0x1c8] sm:$0xff]  ;;  %v3315_v10 = vld [vmem:[%s5326_s28 + $0x198] sm:$0xff] }
  0xb3   : > { %4059 = vmatprep.mubr.f32.mxu1 %v5625_v27  ;;  %4403 = vmatprep.mubr.f32.mxu0 %v5691_v11  ;;  %v4692_v27 = vpack.c.bf16 %v3180_v1, %v3179_v55  ;;  %v3184_v11 = vld [vmem:[%s6416_s1 + $0x1d8] sm:$0xff]  ;;  %v6469_v1 = vld [vmem:[#allocation2_spill] sm:$0xff] }
  0xb4   : > { %4685 = vmatprep.subr.bf16.mxu1 %v4684_v42 }
  0xb5   : > { %4060 = vmatmul.mubr.f32.gmra.mrb[2].mxu1 %v5643_v40  ;;  %v3181_v40 = vld [vmem:[%s6416_s1 + $0x1c0] sm:$0xff] }
  0xb6   : > { %4404 = vmatmul.mubr.f32.gmra.mrb[18].mxu0 %v5706_v24  ;;  %4062 = vmatprep.mubr.f32.mxu1 %v5649_v44  ;;  %v4696_v44 = vpack.c.bf16 %v3182_v2, %v3181_v40  ;;  %v3186_v24 = vld [vmem:[%s6416_s1 + $0x1e8] sm:$0xff]  ;;  %v3336_v2 = vld [vmem:[%s5326_s28 + $0x51] sm:$0xff] }
  0xb7   : > { %4406 = vmatprep.mubr.f32.mxu0 %v5713_v32  ;;  %4687 = vmatpush3.bf16.msra.mxu1 %v4684_v42  ;;  %v6117_v32 = vld [vmem:[%s5326_s28 + $0x180] sm:$0xff]  ;;  %v3416_v42 = vld [vmem:[%s6416_s1 + $0x418] sm:$0xff]  ;;  %v3418_v40 = vld [vmem:[%s6416_s1 + $0x428] sm:$0xff] }
  0xb8   : > { %4689 = vmatprep.subr.bf16.mxu1 %v4688_v52  ;;  %v4844_v55 = vpack.c.bf16 %v3416_v42, %v3415_v53  ;;  %v6474_v53 = vld [vmem:[#allocation6_spill] sm:$0xff]  ;;  %v3152_v42 = vld [vmem:[%s5326_s28 + $0x98] sm:$0xff] }
  0xb9   : > { %4063 = vmatmul.mubr.f32.gmra.mrb[4].mxu1 %v5666_v54  ;;  %v3183_v54 = vld [vmem:[%s6416_s1 + $0x1d0] sm:$0xff] }
  0xba   : > { %4407 = vmatmul.mubr.f32.gmra.mrb[20].mxu0 %v5728_v60  ;;  %4065 = vmatprep.mubr.f32.mxu1 %v5672_v59  ;;  %v4700_v59 = vpack.c.bf16 %v3184_v11, %v3183_v54  ;;  %v6462_v60 = vld [vmem:[#allocation10_spill] sm:$0xff]  ;;  %v3419_v54 = vld [vmem:[%s6416_s1 + $0x430] sm:$0xff]  ;;  %v3420_v11 = vld [vmem:[%s6416_s1 + $0x438] sm:$0xff] }
  0xbb   : > { %4409 = vmatprep.mubr.f32.mxu0 %v5735_v63  ;;  %4691 = vmatpush3.bf16.msra.mxu1 %v4688_v52  ;;  %v3187_v63 = vld [vmem:[%s6416_s1 + $0x1f0] sm:$0xff] }
  0xbc   : > { %4693 = vmatprep.subr.bf16.mxu1 %v4692_v27  ;;  %v3335_v52 = vld [vmem:[%s5326_s28 + $0x49] sm:$0xff] }
  0xbd   : > { %4066 = vmatmul.mubr.f32.gmra.mrb[6].mxu1 %v5688_v3  ;;  %v3185_v3 = vld [vmem:[%s6416_s1 + $0x1e0] sm:$0xff] }
  0xbe   : > { %4410 = vmatmul.mubr.f32.gmra.mrb[22].mxu0 %v5750_v14  ;;  %4068 = vmatprep.mubr.f32.mxu1 %v5694_v13  ;;  %v6461_v13 = vld [vmem:[#allocation15_spill] sm:$0xff]  ;;  %v3188_v14 = vld [vmem:[%s6416_s1 + $0x1f8] sm:$0xff] }
  0xbf   : > { %4412 = vmatprep.mubr.f32.mxu0 %v5757_v51  ;;  %4695 = vmatpush3.bf16.msra.mxu1 %v4692_v27  ;;  %v6464_v51 = vld [vmem:[#allocation11_spill] sm:$0xff]  ;;  %v4708_v49 = vpack.c.bf16 %v3188_v14, %v3187_v63  ;;  %v3417_v27 = vld [vmem:[%s6416_s1 + $0x420] sm:$0xff]  ;;  %v3428_v14 = vld [vmem:[%s6416_s1 + $0x478] sm:$0xff] }
  0xc0   : > { %4697 = vmatprep.subr.bf16.mxu1 %v4696_v44  ;;  %v3426_v63 = vld [vmem:[%s6416_s1 + $0x468] sm:$0xff] }
  0xc1   : > { %4069 = vmatmul.mubr.f32.gmra.mrb[8].mxu1 %v5710_v30  ;;  %v4704_v30 = vpack.c.bf16 %v3186_v24, %v3185_v3  ;;  %v3422_v3 = vld [vmem:[%s6416_s1 + $0x448] sm:$0xff] }
  0xc2   : > { %4413 = vmatmul.mubr.f32.gmra.mrb[24].mxu0 %v5772_v48  ;;  %4071 = vmatprep.mubr.f32.mxu1 %v5716_v36  ;;  %v6463_v36 = vld [vmem:[#allocation17_spill] sm:$0xff]  ;;  %v6130_v48 = vld [vmem:[%s5326_s28 + $0x188] sm:$0xff] }
  0xc3   : > { %4415 = vmatprep.mubr.f32.mxu0 %v6461_v13  ;;  %4699 = vmatpush3.bf16.msra.mxu1 %v4696_v44  ;;  %v3337_v44 = vld [vmem:[%s5326_s28 + $0x61] sm:$0xff]  ;;  %v3424_v13 = vld [vmem:[%s6416_s1 + $0x458] sm:$0xff] }
  0xc4   : > { %4701 = vmatprep.subr.bf16.mxu1 %v4700_v59 }
  0xc5   : > { %4072 = vmatmul.mubr.f32.gmra.mrb[10].mxu1 %v6462_v60 }
  0xc6   : > { %4416 = vmatmul.mubr.f32.gmra.mrb[26].mxu0 %v6463_v36  ;;  %4074 = vmatprep.mubr.f32.mxu1 %v6464_v51  ;;  %v6470_v36 = vld [vmem:[#allocation18_spill] sm:$0xff]  ;;  %v3146_v51 = vld [vmem:[%s5326_s28 + $0x50] sm:$0xff] }
  0xc7   : > { %4418 = vmatprep.mubr.f32.mxu0 %v6117_v32  ;;  %4703 = vmatpush3.bf16.msra.mxu1 %v4700_v59  ;;  %v4852_v59 = vpack.c.bf16 %v3420_v11, %v3419_v54  ;;  %v3157_v54 = vld [vmem:[%s5326_s28 + $0xd8] sm:$0xff] }
  0xc8   : > { %4705 = vmatprep.subr.bf16.mxu1 %v4704_v30  ;;  %v3381_v11 = vld [vmem:[%s5326_s28 + $0x32] sm:$0xff] }
  0xc9   : > { %4075 = vmatmul.mubr.f32.gmra.mrb[12].mxu1 %v6465_v4  ;;  %v3148_v4 = vld [vmem:[%s5326_s28 + $0x68] sm:$0xff] }
  0xca   : > { %4419 = vmatmul.mubr.f32.gmra.mrb[28].mxu0 %v6130_v48  ;;  %4077 = vmatprep.mubr.f32.mxu1 %v6466_v18  ;;  %v3149_v18 = vld [vmem:[%s5326_s28 + $0x78] sm:$0xff] }
  0xcb   : > { %4421 = vmatprep.mubr.f32.mxu0 %v3315_v10  ;;  %4707 = vmatpush3.bf16.msra.mxu1 %v4704_v30  ;;  %v3343_v30 = vld [vmem:[%s5326_s28 + $0xa9] sm:$0xff]  ;;  %v3147_v10 = vld [vmem:[%s5326_s28 + $0x60] sm:$0xff] }
  0xcc   : > { %4709 = vmatprep.subr.bf16.mxu1 %v4708_v49 }
  0xcd   : > { %4078 = vmatmul.mubr.f32.gmra.mrb[14].mxu1 %v6467_v39  ;;  %v3151_v39 = vld [vmem:[%s5326_s28 + $0x90] sm:$0xff] }
  0xce   : > { %4422 = vmatmul.mubr.f32.gmra.mrb[30].mxu0 %v3316_v41  ;;  %4080 = vmatprep.mubr.f32.mxu1 %v6468_v23  ;;  %v6473_v41 = vld [vmem:[#allocation5_spill] sm:$0xff]  ;;  %v3153_v23 = vld [vmem:[%s5326_s28 + $0xa8] sm:$0xff] }
  0xcf   : > { %4456 = vmatprep.mubr.f32.mxu0 %v3333_v22  ;;  %4711 = vmatpush3.bf16.msra.mxu1 %v4708_v49  ;;  %v6472_v49 = vld [vmem:[#allocation4_spill] sm:$0xff]  ;;  %v3150_v22 = vld [vmem:[%s5326_s28 + $0x80] sm:$0xff] }
  0xd0   : > { %4872 = vmatprep.subr.bf16.mxu1 %v6469_v1 }
  0xd1   : > { %4081 = vmatmul.mubr.f32.gmra.mrb[16].mxu1 %v5798_v17  ;;  %v4848_v17 = vpack.c.bf16 %v3418_v40, %v3417_v27  ;;  %v3155_v27 = vld [vmem:[%s5326_s28 + $0xc0] sm:$0xff] }
  0xd2   : > { %4457 = vmatmul.mubr.f32.vlgmr.msra.gmra.mrb[0].mxu0 %v3334_v56  ;;  %4083 = vmatprep.mubr.f32.mxu1 %v5802_v15  ;;  %v3338_v15 = vld [vmem:[%s5326_s28 + $0x69] sm:$0xff]  ;;  %v6248_v56 = vld [vmem:[%s5326_s28 + $0x181] sm:$0xff]  ;;  %v3363_v40 = vld [vmem:[%s5326_s28 + $0x199] sm:$0xff] }
  0xd3   : > { %4459 = vmatprep.mubr.f32.mxu0 %v3335_v52  ;;  %4843 = vmatpush3.bf16.msra.mxu0 %v6053_v45  ;;  %v3339_v45 = vld [vmem:[%s5326_s28 + $0x79] sm:$0xff]  ;;  %v6475_v52 = vld [vmem:[#allocation7_spill] sm:$0xff] }
  0xd4   : > { %4845 = vmatprep.subr.bf16.mxu0 %v4844_v55 }
  0xd5   : > { %4084 = vmatmul.mubr.f32.gmra.mrb[18].mxu1 %v5817_v37  ;;  %v3421_v37 = vld [vmem:[%s6416_s1 + $0x440] sm:$0xff] }
  0xd6   : > { %4460 = vmatmul.mubr.f32.gmra.mrb[2].mxu0 %v3336_v2  ;;  %4086 = vmatprep.mubr.f32.mxu1 %v5820_v50  ;;  %v3340_v50 = vld [vmem:[%s5326_s28 + $0x81] sm:$0xff]  ;;  %v4856_v24 = vpack.c.bf16 %v3422_v3, %v3421_v37  ;;  %v6476_v2 = vld [vmem:[#allocation8_spill] sm:$0xff] }
  0xd7   : > { %4462 = vmatprep.mubr.f32.mxu0 %v3337_v44  ;;  %4847 = vmatpush3.bf16.msra.mxu0 %v4844_v55  ;;  %v3154_v55 = vld [vmem:[%s5326_s28 + $0xb0] sm:$0xff]  ;;  %v3156_v44 = vld [vmem:[%s5326_s28 + $0xc8] sm:$0xff] }
  0xd8   : > { %4849 = vmatprep.subr.bf16.mxu0 %v4848_v17  ;;  %v3159_v37 = vld [vmem:[%s5326_s28 + $0xf0] sm:$0xff] }
  0xd9   : > { %4087 = vmatmul.mubr.f32.gmra.mrb[20].mxu1 %v5834_v7  ;;  %v3423_v7 = vld [vmem:[%s6416_s1 + $0x450] sm:$0xff] }
  0xda   : > { %4463 = vmatmul.mubr.f32.gmra.mrb[4].mxu0 %v3338_v15  ;;  %4089 = vmatprep.mubr.f32.mxu1 %v5837_v12  ;;  %v3342_v12 = vld [vmem:[%s5326_s28 + $0x99] sm:$0xff]  ;;  %v4860_v60 = vpack.c.bf16 %v3424_v13, %v3423_v7  ;;  %v3383_v3 = vld [vmem:[%s5326_s28 + $0x4a] sm:$0xff]  ;;  %v3385_v13 = vld [vmem:[%s5326_s28 + $0x62] sm:$0xff] }
  0xdb   : > { %4465 = vmatprep.mubr.f32.mxu0 %v3339_v45  ;;  %4851 = vmatpush3.bf16.msra.mxu0 %v4848_v17  ;;  %v3364_v17 = vld [vmem:[%s5326_s28 + $0x1a1] sm:$0xff]  ;;  %v6477_v15 = vld [vmem:[#allocation9_spill] sm:$0xff] }
  0xdc   : > { %4853 = vmatprep.subr.bf16.mxu0 %v4852_v59  ;;  %v3158_v45 = vld [vmem:[%s5326_s28 + $0xe0] sm:$0xff]  ;;  %v3161_v7 = vld [vmem:[%s5326_s28 + $0x108] sm:$0xff] }
  0xdd   : > { %4090 = vmatmul.mubr.f32.gmra.mrb[22].mxu1 %v5850_v29  ;;  %v3425_v29 = vld [vmem:[%s6416_s1 + $0x460] sm:$0xff] }
  0xde   : > { %4466 = vmatmul.mubr.f32.gmra.mrb[6].mxu0 %v3340_v50  ;;  %4092 = vmatprep.mubr.f32.mxu1 %v5853_v61  ;;  %v4864_v61 = vpack.c.bf16 %v3426_v63, %v3425_v29  ;;  %v3160_v50 = vld [vmem:[%s5326_s28 + $0xf8] sm:$0xff]  ;;  %v3164_v63 = vld [vmem:[%s5326_s28 + $0x128] sm:$0xff] }
  0xdf   : > { %4468 = vmatprep.mubr.f32.mxu0 %v5541_v47  ;;  %4855 = vmatpush3.bf16.msra.mxu0 %v4852_v59  ;;  %v3344_v47 = vld [vmem:[%s5326_s28 + $0xb1] sm:$0xff]  ;;  %v3382_v59 = vld [vmem:[%s5326_s28 + $0x3a] sm:$0xff] }
  0xe0   : > { %4857 = vmatprep.subr.bf16.mxu0 %v4856_v24  ;;  %v3387_v29 = vld [vmem:[%s5326_s28 + $0x7a] sm:$0xff] }
  0xe1   : > { %4093 = vmatmul.mubr.f32.gmra.mrb[24].mxu1 %v5866_v19  ;;  %v3427_v19 = vld [vmem:[%s6416_s1 + $0x470] sm:$0xff] }
  0xe2   : > { %4469 = vmatmul.mubr.f32.gmra.mrb[8].mxu0 %v3342_v12  ;;  %4095 = vmatprep.mubr.f32.mxu1 %v5869_v8  ;;  %v4868_v8 = vpack.c.bf16 %v3428_v14, %v3427_v19  ;;  %v3162_v12 = vld [vmem:[%s5326_s28 + $0x110] sm:$0xff]  ;;  %v3166_v14 = vld [vmem:[%s5326_s28 + $0x140] sm:$0xff] }
  0xe3   : > { %4471 = vmatprep.mubr.f32.mxu0 %v3343_v30  ;;  %4859 = vmatpush3.bf16.msra.mxu0 %v4856_v24  ;;  %v3384_v24 = vld [vmem:[%s5326_s28 + $0x52] sm:$0xff]  ;;  %v3386_v30 = vld [vmem:[%s5326_s28 + $0x6a] sm:$0xff] }
  0xe4   : > { %4861 = vmatprep.subr.bf16.mxu0 %v4860_v60  ;;  %v3389_v19 = vld [vmem:[%s5326_s28 + $0x92] sm:$0xff] }
  0xe5   : > { %4096 = vmatmul.mubr.f32.gmra.mrb[26].mxu1 %v5882_v43  ;;  %v3141_v43 = vld [vmem:[%s5326_s28 + $0x18] sm:$0xff] }
  0xe6   : > { %4472 = vmatmul.mubr.f32.gmra.mrb[10].mxu0 %v3344_v47  ;;  %4098 = vmatprep.mubr.f32.mxu1 %v5885_v20  ;;  %v3144_v20 = vld [vmem:[%s5326_s28 + $0x38] sm:$0xff]  ;;  %v3388_v47 = vld [vmem:[%s5326_s28 + $0x82] sm:$0xff] }
  0xe7   : > { %4474 = vmatprep.mubr.f32.mxu0 %v5597_v6  ;;  %4863 = vmatpush3.bf16.msra.mxu0 %v4860_v60  ;;  %v3142_v6 = vld [vmem:[%s5326_s28 + $0x20] sm:$0xff] }
  0xe8   : > { %4865 = vmatprep.subr.bf16.mxu0 %v4864_v61  ;;  %v3163_v60 = vld [vmem:[%s5326_s28 + $0x120] sm:$0xff] }
  0xe9   : > { %4099 = vmatmul.mubr.f32.gmra.mrb[28].mxu1 %v6470_v36  ;;  %v3167_v36 = vld [vmem:[%s5326_s28 + $0x150] sm:$0xff] }
  0xea   : > { %4475 = vmatmul.mubr.f32.gmra.mrb[12].mxu0 %v5619_v25  ;;  %4101 = vmatprep.mubr.f32.mxu1 %v5901_v33  ;;  %v3143_v25 = vld [vmem:[%s5326_s28 + $0x30] sm:$0xff]  ;;  %v3145_v33 = vld [vmem:[%s5326_s28 + $0x48] sm:$0xff] }
  0xeb   : > { %4477 = vmatprep.mubr.f32.mxu0 %v5939_v58  ;;  %4867 = vmatpush3.bf16.msra.mxu0 %v4864_v61  ;;  %v3165_v61 = vld [vmem:[%s5326_s28 + $0x138] sm:$0xff] }
  0xec   : > { %4869 = vmatprep.subr.bf16.mxu0 %v4868_v8 }
  0xed   : > { %4102 = vmatmul.mubr.f32.gmra.mrb[30].mxu1 %v5914_v31  ;;  %v6471_v31 = vld [vmem:[#allocation3_spill] sm:$0xff] }
  0xee   : > { %4478 = vmatmul.mubr.f32.gmra.mrb[14].mxu0 %v5952_v9  ;;  %4136 = vmatprep.mubr.f32.mxu1 %v3141_v43  ;;  %v3391_v43 = vld [vmem:[%s5326_s28 + $0xaa] sm:$0xff] }
  0xef   : > { %4480 = vmatprep.mubr.f32.mxu0 %v5957_v0  ;;  %4871 = vmatpush3.bf16.msra.mxu0 %v4868_v8  ;;  %v3390_v8 = vld [vmem:[%s5326_s28 + $0x9a] sm:$0xff] }
  0xf1   : > { %4137 = vmatmul.mubr.f32.vlgmr.msra.gmra.mrb[0].mxu1 %v3142_v6  ;;  %v3168_v6 = vld [vmem:[%s5326_s28 + $0x158] sm:$0xff] }
  0xf2   : > { %4481 = vmatmul.mubr.f32.gmra.mrb[16].mxu0 %v5969_v21  ;;  %4880 = vmatpush3.bf16.msra.mxu1 %v6469_v1  ;;  %v6255_v1 = vld [vmem:[%s5326_s28 + $0x189] sm:$0xff] }
  0xf3   : > { %4139 = vmatprep.mubr.f32.mxu1 %v3143_v25  ;;  %4483 = vmatprep.mubr.f32.mxu0 %v5973_v62  ;;  %v3392_v25 = vld [vmem:[%s5326_s28 + $0xb2] sm:$0xff] }
  0xf4   : > { %4873 = vmatprep.subr.bf16.mxu1 %v6471_v31 }
  0xf5   : > { %4140 = vmatmul.mubr.f32.gmra.mrb[2].mxu1 %v3144_v20  ;;  %v3169_v20 = vld [vmem:[%s5326_s28 + $0x168] sm:$0xff] }
  0xf6   : > { %4484 = vmatmul.mubr.f32.gmra.mrb[18].mxu0 %v5985_v34  ;;  %4142 = vmatprep.mubr.f32.mxu1 %v3145_v33  ;;  %v3393_v33 = vld [vmem:[%s5326_s28 + $0xc2] sm:$0xff] }
  0xf7   : > { %4486 = vmatprep.mubr.f32.mxu0 %v5989_v35  ;;  %4881 = vmatpush3.bf16.msra.mxu1 %v6471_v31  ;;  %v3170_v31 = vld [vmem:[%s5326_s28 + $0x170] sm:$0xff] }
  0xf8   : > { %4874 = vmatprep.subr.bf16.mxu1 %v6472_v49 }
  0xf9   : > { %4143 = vmatmul.mubr.f32.gmra.mrb[4].mxu1 %v3146_v51  ;;  %v3394_v51 = vld [vmem:[%s5326_s28 + $0xca] sm:$0xff] }
  0xfa   : > { %4487 = vmatmul.mubr.f32.gmra.mrb[20].mxu0 %v6001_v46  ;;  %4145 = vmatprep.mubr.f32.mxu1 %v3147_v10  ;;  %v3395_v10 = vld [vmem:[%s5326_s28 + $0xda] sm:$0xff] }
  0xfb   : > { %4489 = vmatprep.mubr.f32.mxu0 %v6005_v38  ;;  %4882 = vmatpush3.bf16.msra.mxu1 %v6472_v49  ;;  %v3396_v49 = vld [vmem:[%s5326_s28 + $0xe2] sm:$0xff] }
  0xfc   : > { %4875 = vmatprep.subr.bf16.mxu1 %v6473_v41 }
  0xfd   : > { %4146 = vmatmul.mubr.f32.gmra.mrb[6].mxu1 %v3148_v4  ;;  %v3397_v4 = vld [vmem:[%s5326_s28 + $0xf2] sm:$0xff] }
  0xfe   : > { %4490 = vmatmul.mubr.f32.gmra.mrb[22].mxu0 %v6017_v57  ;;  %4148 = vmatprep.mubr.f32.mxu1 %v3149_v18  ;;  %v3398_v18 = vld [vmem:[%s5326_s28 + $0xfa] sm:$0xff] }
  0xff   : > { %4492 = vmatprep.mubr.f32.mxu0 %v6021_v16  ;;  %4883 = vmatpush3.bf16.msra.mxu1 %v6473_v41  ;;  %v3399_v41 = vld [vmem:[%s5326_s28 + $0x10a] sm:$0xff] }
 0x100   : > { %4876 = vmatprep.subr.bf16.mxu1 %v6474_v53 }
 0x101   : > { %4149 = vmatmul.mubr.f32.gmra.mrb[8].mxu1 %v3150_v22  ;;  %v3401_v22 = vld [vmem:[%s5326_s28 + $0x122] sm:$0xff] }
 0x102   : > { %4493 = vmatmul.mubr.f32.gmra.mrb[24].mxu0 %v6033_v5  ;;  %4151 = vmatprep.mubr.f32.mxu1 %v3151_v39 }
 0x103   : > { %4495 = vmatprep.mubr.f32.mxu0 %v6037_v28  ;;  %4884 = vmatpush3.bf16.msra.mxu1 %v6474_v53 }
 0x104   : > { %4877 = vmatprep.subr.bf16.mxu1 %v6475_v52 }
 0x105   : > { %4152 = vmatmul.mubr.f32.gmra.mrb[10].mxu1 %v3152_v42 }
 0x106   : > { %4496 = vmatmul.mubr.f32.gmra.mrb[26].mxu0 %v6049_v26  ;;  %4154 = vmatprep.mubr.f32.mxu1 %v3153_v23 }
 0x107   : > { %4498 = vmatprep.mubr.f32.mxu0 %v6248_v56  ;;  %4885 = vmatpush3.bf16.msra.mxu1 %v6475_v52 }
 0x108   : > { %4878 = vmatprep.subr.bf16.mxu1 %v6476_v2 }
 0x109   : > { %4155 = vmatmul.mubr.f32.gmra.mrb[12].mxu1 %v3154_v55 }
 0x10a   : > { %4499 = vmatmul.mubr.f32.gmra.mrb[28].mxu0 %v6255_v1  ;;  %4157 = vmatprep.mubr.f32.mxu1 %v3155_v27 }
 0x10b   : > { %4501 = vmatprep.mubr.f32.mxu0 %v3363_v40  ;;  %4886 = vmatpush3.bf16.msra.mxu1 %v6476_v2 }
 0x10c   : > { %4879 = vmatprep.subr.bf16.mxu1 %v6477_v15 }
 0x10d   : > { %4158 = vmatmul.mubr.f32.gmra.mrb[14].mxu1 %v3156_v44 }
 0x10e   : > { %4502 = vmatmul.mubr.f32.gmra.mrb[30].mxu0 %v3364_v17  ;;  %4160 = vmatprep.mubr.f32.mxu1 %v3157_v54 }
 0x10f   : > { %4536 = vmatprep.mubr.f32.mxu0 %v3381_v11  ;;  %4887 = vmatpush3.bf16.msra.mxu1 %v6477_v15 }
 0x111   : > { %4161 = vmatmul.mubr.f32.gmra.mrb[16].mxu1 %v3158_v45 }
 0x112   : > { %4537 = vmatmul.mubr.f32.vlgmr.msra.gmra.mrb[0].mxu0 %v3382_v59  ;;  %4163 = vmatprep.mubr.f32.mxu1 %v3159_v37 }
 0x113   : > { %4539 = vmatprep.mubr.f32.mxu0 %v3383_v3 }
 0x115   : > { %4164 = vmatmul.mubr.f32.gmra.mrb[18].mxu1 %v3160_v50 }
 0x116   : > { %4540 = vmatmul.mubr.f32.gmra.mrb[2].mxu0 %v3384_v24  ;;  %4166 = vmatprep.mubr.f32.mxu1 %v3161_v7 }
 0x117   : > { %4542 = vmatprep.mubr.f32.mxu0 %v3385_v13 }
 0x119   : > { %4167 = vmatmul.mubr.f32.gmra.mrb[20].mxu1 %v3162_v12 }
 0x11a   : > { %4543 = vmatmul.mubr.f32.gmra.mrb[4].mxu0 %v3386_v30  ;;  %4169 = vmatprep.mubr.f32.mxu1 %v3163_v60 }
 0x11b   : > { %4545 = vmatprep.mubr.f32.mxu0 %v3387_v29 }
 0x11d   : > { %4170 = vmatmul.mubr.f32.gmra.mrb[22].mxu1 %v3164_v63 }
 0x11e   : > { %4546 = vmatmul.mubr.f32.gmra.mrb[6].mxu0 %v3388_v47  ;;  %4172 = vmatprep.mubr.f32.mxu1 %v3165_v61 }
 0x11f   : > { %4548 = vmatprep.mubr.f32.mxu0 %v3389_v19 }
 0x121   : > { %4173 = vmatmul.mubr.f32.gmra.mrb[24].mxu1 %v3166_v14 }
 0x122   : > { %4549 = vmatmul.mubr.f32.gmra.mrb[8].mxu0 %v3390_v8  ;;  %4175 = vmatprep.mubr.f32.mxu1 %v3167_v36 }
 0x123   : > { %4551 = vmatprep.mubr.f32.mxu0 %v3391_v43 }
 0x125   : > { %4176 = vmatmul.mubr.f32.gmra.mrb[26].mxu1 %v3168_v6 }
 0x126   : > { %4552 = vmatmul.mubr.f32.gmra.mrb[10].mxu0 %v3392_v25  ;;  %4178 = vmatprep.mubr.f32.mxu1 %v3169_v20 }
 0x127   : > { %4554 = vmatprep.mubr.f32.mxu0 %v3393_v33 }
 0x129   : > { %4179 = vmatmul.mubr.f32.gmra.mrb[28].mxu1 %v3170_v31 }
 0x12a   : > { %4555 = vmatmul.mubr.f32.gmra.mrb[12].mxu0 %v3394_v51  ;;  %4181 = vmatprep.mubr.f32.mxu1 %v6117_v32  ;;  %v3400_v32 = vld [vmem:[%s5326_s28 + $0x112] sm:$0xff] }
 0x12b   : > { %4557 = vmatprep.mubr.f32.mxu0 %v3395_v10 }
 0x12d   : > { %4182 = vmatmul.mubr.f32.gmra.mrb[30].mxu1 %v6130_v48  ;;  %v3403_v48 = vld [vmem:[%s5326_s28 + $0x13a] sm:$0xff] }
 0x12e   : > { %4558 = vmatmul.mubr.f32.gmra.mrb[14].mxu0 %v3396_v49  ;;  %4240 = vmatprep.mubr.f32.mxu1 %v5939_v58  ;;  %v3402_v58 = vld [vmem:[%s5326_s28 + $0x12a] sm:$0xff] }
 0x12f   : > { %4560 = vmatprep.mubr.f32.mxu0 %v3397_v4 }
 0x131   : > { %4241 = vmatmul.mubr.f32.vlgmr.msra.gmra.mrb[16].mxu1 %v5952_v9  ;;  %v3404_v9 = vld [vmem:[%s5326_s28 + $0x142] sm:$0xff] }
 0x132   : > { %4561 = vmatmul.mubr.f32.gmra.mrb[16].mxu0 %v3398_v18  ;;  %4243 = vmatprep.mubr.f32.mxu1 %v5957_v0  ;;  %v3405_v0 = vld [vmem:[%s5326_s28 + $0x152] sm:$0xff] }
 0x133   : > { %4563 = vmatprep.mubr.f32.mxu0 %v3399_v41 }
 0x135   : > { %4244 = vmatmul.mubr.f32.gmra.mrb[18].mxu1 %v5969_v21  ;;  %v3406_v21 = vld [vmem:[%s5326_s28 + $0x15a] sm:$0xff] }
 0x136   : > { %4564 = vmatmul.mubr.f32.gmra.mrb[18].mxu0 %v3400_v32  ;;  %4246 = vmatprep.mubr.f32.mxu1 %v5973_v62  ;;  %v3407_v62 = vld [vmem:[%s5326_s28 + $0x16a] sm:$0xff] }
 0x137   : > { %4566 = vmatprep.mubr.f32.mxu0 %v3401_v22 }
 0x139   : > { %4247 = vmatmul.mubr.f32.gmra.mrb[20].mxu1 %v5985_v34  ;;  %v3408_v34 = vld [vmem:[%s5326_s28 + $0x172] sm:$0xff] }
 0x13a   : > { %4567 = vmatmul.mubr.f32.gmra.mrb[20].mxu0 %v3402_v58  ;;  %4249 = vmatprep.mubr.f32.mxu1 %v5989_v35  ;;  %v3409_v35 = vld [vmem:[%s5326_s28 + $0x182] sm:$0xff] }
 0x13b   : > { %4569 = vmatprep.mubr.f32.mxu0 %v3403_v48 }
 0x13d   : > { %4250 = vmatmul.mubr.f32.gmra.mrb[22].mxu1 %v6001_v46  ;;  %v3410_v46 = vld [vmem:[%s5326_s28 + $0x18a] sm:$0xff] }
 0x13e   : > { %4570 = vmatmul.mubr.f32.gmra.mrb[22].mxu0 %v3404_v9  ;;  %4252 = vmatprep.mubr.f32.mxu1 %v6005_v38  ;;  %v3411_v38 = vld [vmem:[%s5326_s28 + $0x19a] sm:$0xff] }
 0x13f   : > { %4572 = vmatprep.mubr.f32.mxu0 %v3405_v0 }
 0x141   : > { %4253 = vmatmul.mubr.f32.gmra.mrb[24].mxu1 %v6017_v57  ;;  %v3412_v57 = vld [vmem:[%s5326_s28 + $0x1a2] sm:$0xff] }
 0x142   : > { %4573 = vmatmul.mubr.f32.gmra.mrb[24].mxu0 %v3406_v21  ;;  %4255 = vmatprep.mubr.f32.mxu1 %v6021_v16 }
 0x143   : > { %4575 = vmatprep.mubr.f32.mxu0 %v3407_v62 }
 0x145   : > { %4256 = vmatmul.mubr.f32.gmra.mrb[26].mxu1 %v6033_v5 }
 0x146   : > { %4576 = vmatmul.mubr.f32.gmra.mrb[26].mxu0 %v3408_v34  ;;  %4258 = vmatprep.mubr.f32.mxu1 %v6037_v28 }
 0x147   : > { %4578 = vmatprep.mubr.f32.mxu0 %v3409_v35 }
 0x149   : > { %4259 = vmatmul.mubr.f32.gmra.mrb[28].mxu1 %v6049_v26 }
 0x14a   : > { %4579 = vmatmul.mubr.f32.gmra.mrb[28].mxu0 %v3410_v46  ;;  %4261 = vmatprep.mubr.f32.mxu1 %v6248_v56 }
 0x14b   : > { %4581 = vmatprep.mubr.f32.mxu0 %v3411_v38 }
 0x14d   : > { %4262 = vmatmul.mubr.f32.gmra.mrb[30].mxu1 %v6255_v1  ;;  %v6334_v1 = vld [vmem:[%s6417_s2] ss:$0 sm:$0xff] }
 0x14e   : > { %4582 = vmatmul.mubr.f32.gmra.mrb[30].mxu0 %v3412_v57 }
 0x1c4   : > { %v4138_v16 = vpop.f32.mrb[0].mxu1 }
 0x1c5   : > { %v1250_v39 = vpop.f32.mrb[1].mxu1  ;;  %v4888_v54 = vadd.f32 %v4138_v16, %v6334_v1 }
 0x1c6   : > { %v4890_v11 = vadd.f32 %v6334_v1, %v1250_v39 }
 0x1c8   : > { %v4141_v5 = vpop.f32.mrb[2].mxu1 }
 0x1c9   : > { %v1260_v53 = vpop.f32.mrb[3].mxu1  ;;  %v4892_v3 = vadd.f32 %v4141_v5, %v6334_v1 }
 0x1ca   : > { %v4894_v50 = vadd.f32 %v6334_v1, %v1260_v53 }
 0x1cc   : > { %v4144_v42 = vpop.f32.mrb[4].mxu1 }
 0x1cd   : > { %v1270_v28 = vpop.f32.mrb[5].mxu1  ;;  %v4896_v30 = vadd.f32 %v4144_v42, %v6334_v1 }
 0x1ce   : > { %v4898_v60 = vadd.f32 %v6334_v1, %v1270_v28 }
 0x1d0   : > { %v4147_v23 = vpop.f32.mrb[6].mxu1 }
 0x1d1   : > { %v1280_v52 = vpop.f32.mrb[7].mxu1  ;;  %v4900_v19 = vadd.f32 %v4147_v23, %v6334_v1 }
 0x1d2   : > { %v4902_v14 = vadd.f32 %v6334_v1, %v1280_v52 }
 0x1d4   : > { %v4150_v55 = vpop.f32.mrb[8].mxu1 }
 0x1d5   : > { %v1290_v27 = vpop.f32.mrb[9].mxu1  ;;  %v4904_v25 = vadd.f32 %v4150_v55, %v6334_v1 }
 0x1d6   : > { %v4906_v20 = vadd.f32 %v6334_v1, %v1290_v27 }
 0x1d8   : > { %v4153_v26 = vpop.f32.mrb[10].mxu1 }
 0x1d9   : > { %v1300_v40 = vpop.f32.mrb[11].mxu1  ;;  %v4908_v49 = vadd.f32 %v4153_v26, %v6334_v1 }
 0x1da   : > { %v4910_v4 = vadd.f32 %v6334_v1, %v1300_v40 }
 0x1dc   : > { %v4156_v2 = vpop.f32.mrb[12].mxu1 }
 0x1dd   : > { %v1310_v56 = vpop.f32.mrb[13].mxu1  ;;  %v4912_v58 = vadd.f32 %v4156_v2, %v6334_v1 }
 0x1de   : > { %v4914_v48 = vadd.f32 %v6334_v1, %v1310_v56 }
 0x1e0   : > { %v4159_v44 = vpop.f32.mrb[14].mxu1 }
 0x1e1   : > { %v1320_v17 = vpop.f32.mrb[15].mxu1  ;;  %v4916_v34 = vadd.f32 %v4159_v44, %v6334_v1 }
 0x1e2   : > { %v4918_v35 = vadd.f32 %v6334_v1, %v1320_v17 }
 0x1e5   : > { %v4538_v15 = vpop.f32.mrb[0].mxu0 }
 0x1e6   : > { %v4889_v45 = vadd.f32 %v4888_v54, %v4538_v15  ;;  %v2781_v59 = vpop.f32.mrb[1].mxu0 }
 0x1e7   : > { %v4891_v37 = vadd.f32 %v4890_v11, %v2781_v59 }
 0x1e8   : > { %2973 = vst [vmem:[%s6342_s24 + $0x8] sm:$0xff] %v4889_v45 }
 0x1e9   : > { %2972 = vst [vmem:[%s6342_s24] sm:$0xff] %v4891_v37  ;;  %v4541_v24 = vpop.f32.mrb[2].mxu0 }
 0x1ea   : > { %v4893_v7 = vadd.f32 %v4892_v3, %v4541_v24  ;;  %v2791_v13 = vpop.f32.mrb[3].mxu0 }
 0x1eb   : > { %v4895_v12 = vadd.f32 %v4894_v50, %v2791_v13 }
 0x1ec   : > { %2975 = vst [vmem:[%s6342_s24 + $0x18] sm:$0xff] %v4893_v7 }
 0x1ed   : > { %2974 = vst [vmem:[%s6342_s24 + $0x10] sm:$0xff] %v4895_v12  ;;  %v4544_v29 = vpop.f32.mrb[4].mxu0 }
 0x1ee   : > { %v4897_v63 = vadd.f32 %v4896_v30, %v4544_v29  ;;  %v2801_v47 = vpop.f32.mrb[5].mxu0 }
 0x1ef   : > { %v4899_v61 = vadd.f32 %v4898_v60, %v2801_v47 }
 0x1f0   : > { %2977 = vst [vmem:[%s6342_s24 + $0x28] sm:$0xff] %v4897_v63 }
 0x1f1   : > { %2976 = vst [vmem:[%s6342_s24 + $0x20] sm:$0xff] %v4899_v61  ;;  %v4547_v8 = vpop.f32.mrb[6].mxu0 }
 0x1f2   : > { %v4901_v36 = vadd.f32 %v4900_v19, %v4547_v8  ;;  %v2811_v43 = vpop.f32.mrb[7].mxu0 }
 0x1f3   : > { %v4903_v6 = vadd.f32 %v4902_v14, %v2811_v43 }
 0x1f4   : > { %2979 = vst [vmem:[%s6342_s24 + $0x38] sm:$0xff] %v4901_v36 }
 0x1f5   : > { %2978 = vst [vmem:[%s6342_s24 + $0x30] sm:$0xff] %v4903_v6  ;;  %v4550_v33 = vpop.f32.mrb[8].mxu0 }
 0x1f6   : > { %v4905_v31 = vadd.f32 %v4904_v25, %v4550_v33  ;;  %v2821_v51 = vpop.f32.mrb[9].mxu0 }
 0x1f7   : > { %v4907_v10 = vadd.f32 %v4906_v20, %v2821_v51 }
 0x1f8   : > { %2981 = vst [vmem:[%s6342_s24 + $0x48] sm:$0xff] %v4905_v31 }
 0x1f9   : > { %2980 = vst [vmem:[%s6342_s24 + $0x40] sm:$0xff] %v4907_v10  ;;  %v4553_v18 = vpop.f32.mrb[10].mxu0 }
 0x1fa   : > { %v4909_v41 = vadd.f32 %v4908_v49, %v4553_v18  ;;  %v2831_v32 = vpop.f32.mrb[11].mxu0 }
 0x1fb   : > { %v4911_v22 = vadd.f32 %v4910_v4, %v2831_v32 }
 0x1fc   : > { %2983 = vst [vmem:[%s6342_s24 + $0x58] sm:$0xff] %v4909_v41 }
 0x1fd   : > { %2982 = vst [vmem:[%s6342_s24 + $0x50] sm:$0xff] %v4911_v22  ;;  %v4556_v9 = vpop.f32.mrb[12].mxu0 }
 0x1fe   : > { %v4913_v0 = vadd.f32 %v4912_v58, %v4556_v9  ;;  %v2841_v21 = vpop.f32.mrb[13].mxu0 }
 0x1ff   : > { %v4915_v62 = vadd.f32 %v4914_v48, %v2841_v21 }
 0x200   : > { %2985 = vst [vmem:[%s6342_s24 + $0x68] sm:$0xff] %v4913_v0 }
 0x201   : > { %2984 = vst [vmem:[%s6342_s24 + $0x60] sm:$0xff] %v4915_v62  ;;  %v4559_v46 = vpop.f32.mrb[14].mxu0 }
 0x202   : > { %v4917_v38 = vadd.f32 %v4916_v34, %v4559_v46  ;;  %v2851_v57 = vpop.f32.mrb[15].mxu0 }
 0x203   : > { %v4919_v16 = vadd.f32 %v4918_v35, %v2851_v57 }
 0x204   : > { %2987 = vst [vmem:[%s6342_s24 + $0x78] sm:$0xff] %v4917_v38  ;;  %v4242_v39 = vpop.f32.mrb[16].mxu1 }
 0x205   : > { %2986 = vst [vmem:[%s6342_s24 + $0x70] sm:$0xff] %v4919_v16  ;;  %v4920_v5 = vadd.f32 %v4242_v39, %v6334_v1  ;;  %v4562_v53 = vpop.f32.mrb[16].mxu0  ;;  %v1636_v42 = vpop.f32.mrb[17].mxu1 }
 0x206   : > { %v4922_v28 = vadd.f32 %v6334_v1, %v1636_v42  ;;  %v2861_v23 = vpop.f32.mrb[17].mxu0 }
 0x207   : > { %v4921_v52 = vadd.f32 %v4920_v5, %v4562_v53 }
 0x208   : > { %v4923_v55 = vadd.f32 %v4922_v28, %v2861_v23  ;;  %v4245_v27 = vpop.f32.mrb[18].mxu1 }
 0x209   : > { %2989 = vst [vmem:[%s6342_s24 + $0x88] sm:$0xff] %v4921_v52  ;;  %v4924_v26 = vadd.f32 %v4245_v27, %v6334_v1  ;;  %v4565_v40 = vpop.f32.mrb[18].mxu0  ;;  %v1646_v2 = vpop.f32.mrb[19].mxu1 }
 0x20a   : > { %2988 = vst [vmem:[%s6342_s24 + $0x80] sm:$0xff] %v4923_v55  ;;  %v4926_v56 = vadd.f32 %v6334_v1, %v1646_v2  ;;  %v2871_v44 = vpop.f32.mrb[19].mxu0 }
 0x20b   : > { %v4925_v17 = vadd.f32 %v4924_v26, %v4565_v40 }
 0x20c   : > { %v4927_v54 = vadd.f32 %v4926_v56, %v2871_v44  ;;  %v4248_v11 = vpop.f32.mrb[20].mxu1 }
 0x20d   : > { %2991 = vst [vmem:[%s6342_s24 + $0x98] sm:$0xff] %v4925_v17  ;;  %v4928_v15 = vadd.f32 %v4248_v11, %v6334_v1  ;;  %v4568_v45 = vpop.f32.mrb[20].mxu0  ;;  %v1656_v59 = vpop.f32.mrb[21].mxu1 }
 0x20e   : > { %2990 = vst [vmem:[%s6342_s24 + $0x90] sm:$0xff] %v4927_v54  ;;  %v4930_v37 = vadd.f32 %v6334_v1, %v1656_v59  ;;  %v2881_v3 = vpop.f32.mrb[21].mxu0 }
 0x20f   : > { %v4929_v50 = vadd.f32 %v4928_v15, %v4568_v45 }
 0x210   : > { %v4931_v24 = vadd.f32 %v4930_v37, %v2881_v3  ;;  %v4251_v7 = vpop.f32.mrb[22].mxu1 }
 0x211   : > { %2993 = vst [vmem:[%s6342_s24 + $0xa8] sm:$0xff] %v4929_v50  ;;  %v4932_v13 = vadd.f32 %v4251_v7, %v6334_v1  ;;  %v4571_v12 = vpop.f32.mrb[22].mxu0  ;;  %v1666_v30 = vpop.f32.mrb[23].mxu1 }
 0x212   : > { %2992 = vst [vmem:[%s6342_s24 + $0xa0] sm:$0xff] %v4931_v24  ;;  %v4934_v60 = vadd.f32 %v6334_v1, %v1666_v30  ;;  %v2891_v29 = vpop.f32.mrb[23].mxu0 }
 0x213   : > { %v4933_v63 = vadd.f32 %v4932_v13, %v4571_v12 }
 0x214   : > { %v4935_v47 = vadd.f32 %v4934_v60, %v2891_v29  ;;  %v4254_v61 = vpop.f32.mrb[24].mxu1 }
 0x215   : > { %2995 = vst [vmem:[%s6342_s24 + $0xb8] sm:$0xff] %v4933_v63  ;;  %v4936_v19 = vadd.f32 %v4254_v61, %v6334_v1  ;;  %v4574_v14 = vpop.f32.mrb[24].mxu0  ;;  %v1676_v8 = vpop.f32.mrb[25].mxu1 }
 0x216   : > { %2994 = vst [vmem:[%s6342_s24 + $0xb0] sm:$0xff] %v4935_v47  ;;  %v4938_v36 = vadd.f32 %v6334_v1, %v1676_v8  ;;  %v2901_v43 = vpop.f32.mrb[25].mxu0 }
 0x217   : > { %v4937_v6 = vadd.f32 %v4936_v19, %v4574_v14 }
 0x218   : > { %v4939_v25 = vadd.f32 %v4938_v36, %v2901_v43  ;;  %v4257_v20 = vpop.f32.mrb[26].mxu1 }
 0x219   : > { %2997 = vst [vmem:[%s6342_s24 + $0xc8] sm:$0xff] %v4937_v6  ;;  %v4940_v33 = vadd.f32 %v4257_v20, %v6334_v1  ;;  %v4577_v31 = vpop.f32.mrb[26].mxu0  ;;  %v1686_v51 = vpop.f32.mrb[27].mxu1 }
 0x21a   : > { %2996 = vst [vmem:[%s6342_s24 + $0xc0] sm:$0xff] %v4939_v25  ;;  %v4942_v10 = vadd.f32 %v6334_v1, %v1686_v51  ;;  %v2911_v49 = vpop.f32.mrb[27].mxu0 }
 0x21b   : > { %v4941_v4 = vadd.f32 %v4940_v33, %v4577_v31 }
 0x21c   : > { %v4943_v18 = vadd.f32 %v4942_v10, %v2911_v49  ;;  %v4260_v41 = vpop.f32.mrb[28].mxu1 }
 0x21d   : > { %2999 = vst [vmem:[%s6342_s24 + $0xd8] sm:$0xff] %v4941_v4  ;;  %v4944_v32 = vadd.f32 %v4260_v41, %v6334_v1  ;;  %v4580_v22 = vpop.f32.mrb[28].mxu0  ;;  %v1696_v58 = vpop.f32.mrb[29].mxu1 }
 0x21e   : > { %2998 = vst [vmem:[%s6342_s24 + $0xd0] sm:$0xff] %v4943_v18  ;;  %v4946_v48 = vadd.f32 %v6334_v1, %v1696_v58  ;;  %v2921_v9 = vpop.f32.mrb[29].mxu0 }
 0x21f   : > { %v4945_v0 = vadd.f32 %v4944_v32, %v4580_v22 }
 0x220   : > { %v4947_v21 = vadd.f32 %v4946_v48, %v2921_v9  ;;  %v4263_v62 = vpop.f32.mrb[30].mxu1 }
 0x221   : > { %3001 = vst [vmem:[%s6342_s24 + $0xe8] sm:$0xff] %v4945_v0  ;;  %v4948_v34 = vadd.f32 %v4263_v62, %v6334_v1  ;;  %v4583_v35 = vpop.f32.mrb[30].mxu0  ;;  %v1706_v46 = vpop.f32.mrb[31].mxu1 }
 0x222   : > { %3000 = vst [vmem:[%s6342_s24 + $0xe0] sm:$0xff] %v4947_v21  ;;  %v4950_v38 = vadd.f32 %v6334_v1, %v1706_v46  ;;  %v2931_v57 = vpop.f32.mrb[31].mxu0 }
 0x223   : > { %v4949_v16 = vadd.f32 %v4948_v34, %v4583_v35 }
 0x224   : > { %v4951_v39 = vadd.f32 %v4950_v38, %v2931_v57 }
 0x225   : > { %3003 = vst [vmem:[%s6342_s24 + $0xf8] sm:$0xff] %v4949_v16 }
 0x226   : > { %3002 = vst [vmem:[%s6342_s24 + $0xf0] sm:$0xff] %v4951_v39 }
 0x227 PF: > { %s13_s14 = sadd.s32 1, %s5223_s14   ;;  %s6478_s12 = smov %s5219_s13 }
 0x228   : > { %p10_p5 = scmp.ge.s32.totalorder %s13_s14, 4   ;;  %s6479_s13 = smov %s6481_s15 }
 0x22a   :  { %12 = sbr.rel (!%p10_p5) target bundleno = 2 (0x2), region = 72 }

</bundles_post_ra>
